<compile_context>
chip_gen: v7x
topology: tpu7x:2x2x1
jax: 0.10.0
libtpu: 0.0.40
codegen_flags: <defaults>
</compile_context>

<pallas_src>
import jax
import jax.numpy as jnp
from jax import lax
from jax.experimental import pallas as pl
from jax.experimental.pallas import tpu as pltpu


# --------------------------------------------------------------------------- #
# Kernels
# --------------------------------------------------------------------------- #
def _ffn_kernel_acc(x_ref, w1_ref, b1_ref, w2_ref, b2_ref, o_ref, acc_ref):
    """Hidden dim streamed over grid axis 1: K reduction via f32 VMEM scratch."""
    k = pl.program_id(1)

    @pl.when(k == 0)
    def _():
        acc_ref[...] = jnp.zeros_like(acc_ref)

    # Linear 1: contract the "in" axis of x and PyTorch-layout W1 (no transpose
    # copy), f32 accumulation on the MXU; bias + ReLU in f32.
    h = lax.dot_general(
        x_ref[...], w1_ref[...],
        dimension_numbers=(((1,), (1,)), ((), ())),
        preferred_element_type=jnp.float32,
    )
    h = jnp.maximum(h + b1_ref[...].astype(jnp.float32), 0.0)
    # Dropout == identity (eval-mode semantics).

    # Linear 2, hidden (K) axis tiled: accumulate into the f32 scratch.
    acc_ref[...] += lax.dot_general(
        h.astype(w2_ref.dtype), w2_ref[...],
        dimension_numbers=(((1,), (1,)), ((), ())),
        preferred_element_type=jnp.float32,
    )

    @pl.when(k == pl.num_programs(1) - 1)
    def _():
        o_ref[...] = (acc_ref[...] + b2_ref[...].astype(jnp.float32)).astype(o_ref.dtype)


def _ffn_kernel_noacc(x_ref, w1_ref, b1_ref, w2_ref, b2_ref, o_ref):
    """Full hidden dim resident per step: no accumulator scratch, direct store."""
    h = lax.dot_general(
        x_ref[...], w1_ref[...],
        dimension_numbers=(((1,), (1,)), ((), ())),
        preferred_element_type=jnp.float32,
    )
    h = jnp.maximum(h + b1_ref[...].astype(jnp.float32), 0.0)
    # Dropout == identity (eval-mode semantics).
    out = lax.dot_general(
        h.astype(w2_ref.dtype), w2_ref[...],
        dimension_numbers=(((1,), (1,)), ((), ())),
        preferred_element_type=jnp.float32,
    )
    o_ref[...] = (out + b2_ref[...].astype(jnp.float32)).astype(o_ref.dtype)


# --------------------------------------------------------------------------- #
# Tiling / budgeting helpers
# --------------------------------------------------------------------------- #
def _tpu_generation():
    """Best-effort TPU generation (7 => v7x, 6 => v6e, 5 => v5e/v5p, ...)."""
    try:
        kind = jax.devices()[0].device_kind.lower()
    except Exception:
        return 7  # conservative default
    for g in (7, 6, 5, 4, 3):
        if (f"v{g}" in kind) or (f"{g}x" in kind) or (f"{g}e" in kind):
            return g
    return 7  # unknown -> most VMEM-constrained budget (safe)


def _round_up(x, q):
    return ((x + q - 1) // q) * q


def _sublane_quantum(itemsize):
    # f32 -> 8 sublanes, bf16 -> 16, int8/fp8 -> 32 (packed sublanes).
    return {4: 8, 2: 16, 1: 32}.get(itemsize, 8)


def _fit_tile(dim, target, quantum):
    """Largest multiple of `quantum` <= target that divides `dim`; else full dim."""
    t = min(target, dim)
    t = (t // quantum) * quantum
    while t >= quantum:
        if dim % t == 0:
            return t
        t -= quantum
    return dim


def _estimate_vmem(tm, tk, emb, isz, osz, kt, wbuf):
    """VMEM bytes including the materialized intermediate h and compiler scratch."""
    b = 2 * tm * emb * isz                      # x tile, double-buffered
    b += wbuf * tk * emb * isz                  # W1 block(s)
    b += wbuf * emb * tk * isz                  # W2 block(s)
    b += 2 * (max(tk, 128) + emb) * isz * 8     # biases (padded, tiny)
    b += 2 * tm * emb * osz                     # output tile, double-buffered
    if kt > 1:
        b += tm * emb * 4                       # f32 accumulator scratch
    b += tm * tk * 4                            # intermediate h (f32)
    if isz != 4:
        b += tm * tk * isz                      # cast of h before matmul 2
    b += 2 * 2**20                              # Mosaic internal scratch headroom
    return b


# --------------------------------------------------------------------------- #
# Wrapper
# --------------------------------------------------------------------------- #
def transformer_ffn_forward(x, w1, b1, w2, b2, *, tm=None, tk=None):
    """Eval-mode forward of transformer_FFN.

    x      : (batch, seq, emb)
    w1, w2 : (emb, emb) in PyTorch nn.Linear layout (out_features, in_features)
    b1, b2 : (emb,)
    Returns (batch, seq, emb).
    """
    batch, seq, emb = x.shape
    M = batch * seq
    x2 = x.reshape(M, emb)
    b1_2d = b1.reshape(1, emb)
    b2_2d = b2.reshape(1, emb)

    isz = jnp.dtype(x.dtype).itemsize
    osz = isz
    quantum = _sublane_quantum(isz)

    gen = _tpu_generation()
    if gen >= 7:                                  # v7x: 64 MiB VMEM per TC
        vmem_cap = 48 * 2**20
        resident_threshold = 20 * 2**20
        tk_floor = 256
        tm_stream_target = 512
    elif gen == 6:                                # v6e: 128 MiB VMEM
        vmem_cap = 100 * 2**20
        resident_threshold = 48 * 2**20
        tk_floor = 256
        tm_stream_target = 1024
    else:                                         # v5e / older: 128 MiB VMEM
        vmem_cap = 100 * 2**20
        resident_threshold = 48 * 2**20
        tk_floor = 128
        tm_stream_target = 1024

    weights_bytes = 2 * emb * emb * isz
    resident = weights_bytes <= resident_threshold

    # ---- hidden (K) tile -------------------------------------------------- #
    if tk is None:
        if resident:
            tk = emb
        else:
            # Stream ~8 MiB weight blocks; keep the contraction depth >= tk_floor
            # so the 256-deep MXU stays filled and acc RMW traffic stays low.
            tk_target = max(tk_floor, ((8 * 2**20) // max(emb * isz, 1)) // 128 * 128)
            tk = tk_target
    tk = _fit_tile(emb, tk, 128)

    # ---- M tile ------------------------------------------------------------ #
    if tm is None:
        tm_target = 512 if (tk == emb) else tm_stream_target
    else:
        tm_target = max(quantum, (tm // quantum) * quantum)
    tm = min(tm_target, _round_up(M, quantum))
    tm = max(quantum, (tm // quantum) * quantum)

    # v7x: make sure the "parallel" M axis has >= 2 blocks for the 2 TensorCores.
    if gen >= 7 and _round_up(M, tm) // tm < 2 and tm > quantum and M > quantum:
        tm = max(quantum, (tm // 2 // quantum) * quantum)

    # ---- shrink-to-fit under the generation-aware VMEM budget --------------- #
    def _est(tm_, tk_):
        kt_ = max(1, emb // tk_)
        wbuf_ = 1 if kt_ == 1 else 2
        return _estimate_vmem(tm_, tk_, emb, isz, osz, kt_, wbuf_)

    while _est(tm, tk) > vmem_cap:
        if tm > quantum:
            tm = max(quantum, (tm // 2 // quantum) * quantum)
        else:
            new_tk = _fit_tile(emb, max(128, tk // 2), 128)
            if new_tk == tk:
                break
            tk = new_tk

    # ---- pad M so tm always divides it (no full-extent fallback) ------------ #
    M_pad = _round_up(M, tm)
    if M_pad != M:
        x2 = jnp.pad(x2, ((0, M_pad - M), (0, 0)))
    m_tiles = M_pad // tm
    kt = emb // tk
    grid = (m_tiles, kt)

    vmem_limit = int(vmem_cap)
    cost = pl.CostEstimate(
        flops=4 * M_pad * emb * emb,              # two (M,E)x(E,E) matmuls
        transcendentals=0,
        bytes_accessed=(M_pad * emb * 2 + 2 * emb * emb + 2 * emb) * isz,
    )

    def _call(single_buffer_weights):
        def _wspec(shape, index_map):
            if single_buffer_weights:
                try:
                    return pl.BlockSpec(shape, index_map, pipeline_mode=pl.Buffered(1))
                except TypeError:
                    return pl.BlockSpec(shape, index_map)
            return pl.BlockSpec(shape, index_map)

        in_specs = [
            pl.BlockSpec((tm, emb), lambda i, k: (i, 0)),     # x tile (full in-dim)
            _wspec((tk, emb), lambda i, k: (k, 0)),           # W1 out-dim tile
            pl.BlockSpec((1, tk), lambda i, k: (0, k)),       # b1 slice
            _wspec((emb, tk), lambda i, k: (0, k)),           # W2 hidden-dim tile
            pl.BlockSpec((1, emb), lambda i, k: (0, 0)),      # b2
        ]
        out_spec = pl.BlockSpec((tm, emb), lambda i, k: (i, 0))

        if kt == 1:
            kernel = _ffn_kernel_noacc
            scratch = []
        else:
            kernel = _ffn_kernel_acc
            scratch = [pltpu.VMEM((tm, emb), jnp.float32)]

        return pl.pallas_call(
            kernel,
            out_shape=jax.ShapeDtypeStruct((M_pad, emb), x.dtype),
            grid_spec=pltpu.PrefetchScalarGridSpec(
                num_scalar_prefetch=0,
                grid=grid,
                in_specs=in_specs,
                out_specs=out_spec,
                scratch_shapes=scratch,
            ),
            compiler_params=pltpu.CompilerParams(
                dimension_semantics=("parallel", "arbitrary"),
                vmem_limit_bytes=vmem_limit,
            ),
            cost_estimate=cost,
        )(x2, w1, b1_2d, w2, b2_2d)

    want_single_buffer = (kt == 1)
    try:
        out2 = _call(want_single_buffer)
    except Exception:
        if not want_single_buffer:
            raise
        out2 = _call(False)   # fall back to default double-buffered weight specs

    if M_pad != M:
        out2 = out2[:M]
    return out2.reshape(batch, seq, emb)


# --------------------------------------------------------------------------- #
# Reference + test
# --------------------------------------------------------------------------- #
def _reference(x, w1, b1, w2, b2):
    h = jnp.maximum(jnp.einsum("bse,oe->bso", x, w1) + b1, 0.0)
    return jnp.einsum("bse,oe->bso", h, w2) + b2


if __name__ == "__main__":
    key = jax.random.PRNGKey(0)
    kx, kw1, kb1, kw2, kb2, kx2 = jax.random.split(key, 6)

    batch, seq, emb = 2, 64, 256
    x = jax.random.normal(kx, (batch, seq, emb), dtype=jnp.float32)
    # PyTorch nn.Linear weight layout: (out_features, in_features)
    bound = 1.0 / (emb ** 0.5)
    w1 = jax.random.uniform(kw1, (emb, emb), minval=-bound, maxval=bound, dtype=jnp.float32)
    b1 = jax.random.uniform(kb1, (emb,), minval=-bound, maxval=bound, dtype=jnp.float32)
    w2 = jax.random.uniform(kw2, (emb, emb), minval=-bound, maxval=bound, dtype=jnp.float32)
    b2 = jax.random.uniform(kb2, (emb,), minval=-bound, maxval=bound, dtype=jnp.float32)

    ref = _reference(x, w1, b1, w2, b2)

    # 1) auto-tuned tiles: resident weights -> no-accumulator kernel path
    out_a = jax.block_until_ready(transformer_ffn_forward(x, w1, b1, w2, b2))
    # 2) explicit small tiles: exercises multi-M-tile + K-accumulator path
    out_b = jax.block_until_ready(transformer_ffn_forward(x, w1, b1, w2, b2, tm=64, tk=128))

    for out in (out_a, out_b):
        assert out.shape == (batch, seq, emb)
        err = float(jnp.max(jnp.abs(out - ref)))
        assert jnp.allclose(out, ref, atol=1e-2, rtol=1e-2), f"mismatch (max abs err {err})"

    # 3) non-divisible M (batch*seq = 100): exercises the padded-M path
    seq3 = 50
    x3 = jax.random.normal(kx2, (batch, seq3, emb), dtype=jnp.float32)
    ref3 = _reference(x3, w1, b1, w2, b2)
    out_c = jax.block_until_ready(transformer_ffn_forward(x3, w1, b1, w2, b2))
    assert out_c.shape == (batch, seq3, emb)
    err3 = float(jnp.max(jnp.abs(out_c - ref3)))
    assert jnp.allclose(out_c, ref3, atol=1e-2, rtol=1e-2), f"mismatch padded (max abs err {err3})"

    print("KERNEL_OK")
</pallas_src>

<mosaic_0001>
module attributes {stable_mosaic.version = 11 : i64} {
  func.func @_ffn_kernel_noacc(%arg0: i32, %arg1: i32, %arg2: memref<64x256xf32, #tpu.memory_space<vmem>>, %arg3: memref<256x256xf32, #tpu.memory_space<vmem>>, %arg4: memref<1x256xf32, #tpu.memory_space<vmem>>, %arg5: memref<256x256xf32, #tpu.memory_space<vmem>>, %arg6: memref<1x256xf32, #tpu.memory_space<vmem>>, %arg7: memref<64x256xf32, #tpu.memory_space<vmem>>) attributes {dimension_semantics = [#tpu.dimension_semantics<parallel>, #tpu.dimension_semantics<arbitrary>], iteration_bounds = array<i64: 2, 1>, scalar_prefetch = 0 : i64, scratch_operands = 0 : i64, tpu.core_type = #tpu.core_type<tc>, window_params = [{transform_indices = @transform_0, window_bounds = array<i64: 64, 256>}, {pipeline_mode = #tpu.pipeline_mode<synchronous>, transform_indices = @transform_1, window_bounds = array<i64: 256, 256>}, {transform_indices = @transform_2, window_bounds = array<i64: 1, 256>}, {pipeline_mode = #tpu.pipeline_mode<synchronous>, transform_indices = @transform_3, window_bounds = array<i64: 256, 256>}, {pipeline_mode = #tpu.pipeline_mode<synchronous>, transform_indices = @transform_4, window_bounds = array<i64: 1, 256>}, {transform_indices = @transform_5, window_bounds = array<i64: 64, 256>}]} {
    %c0 = arith.constant 0 : index
    %c0_0 = arith.constant 0 : index
    %0 = vector.load %arg2[%c0, %c0_0] : memref<64x256xf32, #tpu.memory_space<vmem>>, vector<64x256xf32>
    %c0_1 = arith.constant 0 : index
    %c0_2 = arith.constant 0 : index
    %1 = vector.load %arg3[%c0_1, %c0_2] : memref<256x256xf32, #tpu.memory_space<vmem>>, vector<256x256xf32>
    %cst = arith.constant dense<0.000000e+00> : vector<64x256xf32>
    %2 = tpu.matmul %0, %1, %cst {dimension_numbers = #tpu.dot_dimension_numbers<[1], [1], [0], [0], [0, 0, 1, 0], [], []>} : vector<64x256xf32>, vector<256x256xf32>, vector<64x256xf32> -> vector<64x256xf32>
    %c0_3 = arith.constant 0 : index
    %c0_4 = arith.constant 0 : index
    %3 = vector.load %arg4[%c0_3, %c0_4] : memref<1x256xf32, #tpu.memory_space<vmem>>, vector<1x256xf32>
    %4 = vector.broadcast %3 : vector<1x256xf32> to vector<64x256xf32>
    %5 = arith.addf %2, %4 : vector<64x256xf32>
    %cst_5 = arith.constant 0.000000e+00 : f32
    %6 = vector.broadcast %cst_5 : f32 to vector<64x256xf32>
    %7 = arith.maximumf %5, %6 : vector<64x256xf32>
    %c0_6 = arith.constant 0 : index
    %c0_7 = arith.constant 0 : index
    %8 = vector.load %arg5[%c0_6, %c0_7] : memref<256x256xf32, #tpu.memory_space<vmem>>, vector<256x256xf32>
    %cst_8 = arith.constant dense<0.000000e+00> : vector<64x256xf32>
    %9 = tpu.matmul %7, %8, %cst_8 {dimension_numbers = #tpu.dot_dimension_numbers<[1], [1], [0], [0], [0, 0, 1, 0], [], []>} : vector<64x256xf32>, vector<256x256xf32>, vector<64x256xf32> -> vector<64x256xf32>
    %c0_9 = arith.constant 0 : index
    %c0_10 = arith.constant 0 : index
    %10 = vector.load %arg6[%c0_9, %c0_10] : memref<1x256xf32, #tpu.memory_space<vmem>>, vector<1x256xf32>
    %11 = vector.broadcast %10 : vector<1x256xf32> to vector<64x256xf32>
    %12 = arith.addf %9, %11 : vector<64x256xf32>
    %c0_11 = arith.constant 0 : index
    %c0_12 = arith.constant 0 : index
    %13 = vector.load %arg7[%c0_11, %c0_12] : memref<64x256xf32, #tpu.memory_space<vmem>>, vector<64x256xf32>
    tpu.vector_store %arg7[%c0_11, %c0_12], %12 {strides = array<i32>} : memref<64x256xf32, #tpu.memory_space<vmem>>, vector<64x256xf32>,
    return
  }
  func.func @transform_0(%arg0: i32, %arg1: i32) -> (i32, i32) {
    %c0_i32 = arith.constant 0 : i32
    %c0_i32_0 = arith.constant 0 : i32
    return %arg0, %c0_i32 : i32, i32
  }
  func.func @transform_1(%arg0: i32, %arg1: i32) -> (i32, i32) {
    %c0_i32 = arith.constant 0 : i32
    %c0_i32_0 = arith.constant 0 : i32
    return %arg1, %c0_i32 : i32, i32
  }
  func.func @transform_2(%arg0: i32, %arg1: i32) -> (i32, i32) {
    %c0_i32 = arith.constant 0 : i32
    %c0_i32_0 = arith.constant 0 : i32
    return %c0_i32, %arg1 : i32, i32
  }
  func.func @transform_3(%arg0: i32, %arg1: i32) -> (i32, i32) {
    %c0_i32 = arith.constant 0 : i32
    %c0_i32_0 = arith.constant 0 : i32
    return %c0_i32, %arg1 : i32, i32
  }
  func.func @transform_4(%arg0: i32, %arg1: i32) -> (i32, i32) {
    %c0_i32 = arith.constant 0 : i32
    %c0_i32_0 = arith.constant 0 : i32
    %c0_i32_1 = arith.constant 0 : i32
    return %c0_i32, %c0_i32_0 : i32, i32
  }
  func.func @transform_5(%arg0: i32, %arg1: i32) -> (i32, i32) {
    %c0_i32 = arith.constant 0 : i32
    %c0_i32_0 = arith.constant 0 : i32
    return %arg0, %c0_i32 : i32, i32
  }
}

module attributes {stable_mosaic.version = 11 : i64} {
  func.func @_ffn_kernel_noacc(%arg0: i32, %arg1: i32, %arg2: memref<64x256xf32, #tpu.memory_space<vmem>>, %arg3: memref<256x256xf32, #tpu.memory_space<vmem>>, %arg4: memref<1x256xf32, #tpu.memory_space<vmem>>, %arg5: memref<256x256xf32, #tpu.memory_space<vmem>>, %arg6: memref<1x256xf32, #tpu.memory_space<vmem>>, %arg7: memref<64x256xf32, #tpu.memory_space<vmem>>) attributes {dimension_semantics = [#tpu.dimension_semantics<parallel>, #tpu.dimension_semantics<arbitrary>], iteration_bounds = array<i64: 2, 1>, scalar_prefetch = 0 : i64, scratch_operands = 0 : i64, tpu.core_type = #tpu.core_type<tc>, window_params = [{transform_indices = @transform_0, window_bounds = array<i64: 64, 256>}, {transform_indices = @transform_1, window_bounds = array<i64: 256, 256>}, {transform_indices = @transform_2, window_bounds = array<i64: 1, 256>}, {transform_indices = @transform_3, window_bounds = array<i64: 256, 256>}, {pipeline_mode = #tpu.pipeline_mode<synchronous>, transform_indices = @transform_4, window_bounds = array<i64: 1, 256>}, {transform_indices = @transform_5, window_bounds = array<i64: 64, 256>}]} {
    %c0 = arith.constant 0 : index
    %c0_0 = arith.constant 0 : index
    %0 = vector.load %arg2[%c0, %c0_0] : memref<64x256xf32, #tpu.memory_space<vmem>>, vector<64x256xf32>
    %c0_1 = arith.constant 0 : index
    %c0_2 = arith.constant 0 : index
    %1 = vector.load %arg3[%c0_1, %c0_2] : memref<256x256xf32, #tpu.memory_space<vmem>>, vector<256x256xf32>
    %cst = arith.constant dense<0.000000e+00> : vector<64x256xf32>
    %2 = tpu.matmul %0, %1, %cst {dimension_numbers = #tpu.dot_dimension_numbers<[1], [1], [0], [0], [0, 0, 1, 0], [], []>} : vector<64x256xf32>, vector<256x256xf32>, vector<64x256xf32> -> vector<64x256xf32>
    %c0_3 = arith.constant 0 : index
    %c0_4 = arith.constant 0 : index
    %3 = vector.load %arg4[%c0_3, %c0_4] : memref<1x256xf32, #tpu.memory_space<vmem>>, vector<1x256xf32>
    %4 = vector.broadcast %3 : vector<1x256xf32> to vector<64x256xf32>
    %5 = arith.addf %2, %4 : vector<64x256xf32>
    %cst_5 = arith.constant 0.000000e+00 : f32
    %6 = vector.broadcast %cst_5 : f32 to vector<64x256xf32>
    %7 = arith.maximumf %5, %6 : vector<64x256xf32>
    %c0_6 = arith.constant 0 : index
    %c0_7 = arith.constant 0 : index
    %8 = vector.load %arg5[%c0_6, %c0_7] : memref<256x256xf32, #tpu.memory_space<vmem>>, vector<256x256xf32>
    %cst_8 = arith.constant dense<0.000000e+00> : vector<64x256xf32>
    %9 = tpu.matmul %7, %8, %cst_8 {dimension_numbers = #tpu.dot_dimension_numbers<[1], [1], [0], [0], [0, 0, 1, 0], [], []>} : vector<64x256xf32>, vector<256x256xf32>, vector<64x256xf32> -> vector<64x256xf32>
    %c0_9 = arith.constant 0 : index
    %c0_10 = arith.constant 0 : index
    %10 = vector.load %arg6[%c0_9, %c0_10] : memref<1x256xf32, #tpu.memory_space<vmem>>, vector<1x256xf32>
    %11 = vector.broadcast %10 : vector<1x256xf32> to vector<64x256xf32>
    %12 = arith.addf %9, %11 : vector<64x256xf32>
    %c0_11 = arith.constant 0 : index
    %c0_12 = arith.constant 0 : index
    %13 = vector.load %arg7[%c0_11, %c0_12] : memref<64x256xf32, #tpu.memory_space<vmem>>, vector<64x256xf32>
    tpu.vector_store %arg7[%c0_11, %c0_12], %12 {strides = array<i32>} : memref<64x256xf32, #tpu.memory_space<vmem>>, vector<64x256xf32>,
    return
  }
  func.func @transform_0(%arg0: i32, %arg1: i32) -> (i32, i32) {
    %c0_i32 = arith.constant 0 : i32
    %c0_i32_0 = arith.constant 0 : i32
    return %arg0, %c0_i32 : i32, i32
  }
  func.func @transform_1(%arg0: i32, %arg1: i32) -> (i32, i32) {
    %c0_i32 = arith.constant 0 : i32
    %c0_i32_0 = arith.constant 0 : i32
    return %arg1, %c0_i32 : i32, i32
  }
  func.func @transform_2(%arg0: i32, %arg1: i32) -> (i32, i32) {
    %c0_i32 = arith.constant 0 : i32
    %c0_i32_0 = arith.constant 0 : i32
    return %c0_i32, %arg1 : i32, i32
  }
  func.func @transform_3(%arg0: i32, %arg1: i32) -> (i32, i32) {
    %c0_i32 = arith.constant 0 : i32
    %c0_i32_0 = arith.constant 0 : i32
    return %c0_i32, %arg1 : i32, i32
  }
  func.func @transform_4(%arg0: i32, %arg1: i32) -> (i32, i32) {
    %c0_i32 = arith.constant 0 : i32
    %c0_i32_0 = arith.constant 0 : i32
    %c0_i32_1 = arith.constant 0 : i32
    return %c0_i32, %c0_i32_0 : i32, i32
  }
  func.func @transform_5(%arg0: i32, %arg1: i32) -> (i32, i32) {
    %c0_i32 = arith.constant 0 : i32
    %c0_i32_0 = arith.constant 0 : i32
    return %arg0, %c0_i32 : i32, i32
  }
}

</mosaic_0001>

<bundles_post_ra>
// kernel: tpu_custom_call.1
= control target key start
LH: loop header
LB: loop body
LE: loop exit
PB: predicated region body
PF: predicated region fallthrough
CT: control target
= control target key end

     0   :  { %10 = vsyncpa [#allocation3], 0  ;;  %s1658_s0 = inlined_call_operand.hbm [shape: f32[128,256], index: 0, kind: input, shape index: {}]   ;;  %s1659_s1 = inlined_call_operand.hbm [shape: f32[256,256], index: 1, kind: input, shape index: {}]   ;;  %s1660_s2 = inlined_call_operand.vmem [shape: f32[1,256], index: 2, kind: input, shape index: {}]   ;;  %s1661_s3 = inlined_call_operand.hbm [shape: f32[256,256], index: 3, kind: input, shape index: {}]   ;;  %s1662_s4 = inlined_call_operand.vmem [shape: f32[1,256], index: 4, kind: input, shape index: {}]   ;;  %s1663_s5 = inlined_call_operand.hbm [shape: f32[128,256], index: 5, kind: output, shape index: {}]  }
   0x1   :  { %12 = vsyncpa [#allocation3 + $0x1], 0 }
   0x2   :  { %13 = vsyncpa [#allocation6], 0 }
   0x3   :  { %14 = vsyncpa [#allocation4], 0 }
   0x4   :  { %16 = vsyncpa [#allocation4 + $0x1], 0  ;;  %s1335_s18 = smov 0   ;;  %s1337_s19 = smov 0  }
   0x5   :  { %s1339_s20 = smov 0   ;;  %s1341_s21 = smov 0  }
   0x6   :  { %s1343_s22 = smov 0   ;;  %s1345_s23 = smov 0  }
   0x7 LB: > { %s882_s24 = sadd.s32 4294967295, %s1295_s23   ;;  %s883_s25 = sadd.s32 4294967294, %s1295_s23   ;;  %s1295_s23 = sphi %s1345_s23, %s22_s23   ;;  %s1291_s22 = sphi %s1343_s22, %s1687_s22   ;;  %s1287_s21 = sphi %s1341_s21, %s1686_s21   ;;  %s1283_s20 = sphi %s1339_s20, %s1685_s20   ;;  %s1279_s19 = sphi %s1337_s19, %s1684_s19   ;;  %s1275_s18 = sphi %s1335_s18, %s1683_s18  }
   0x8   : > { %p54_p0 = scmp.ne.s32.totalorder %s1279_s19, %s1275_s18  ;;  %p1369_p1 = scmp.eq.s32.totalorder %s882_s24, 0 }
   0x9   : > { %p1373_p2 = scmp.eq.s32.totalorder %s882_s24, 1  ;;  %p183_p3 = scmp.eq.s32.totalorder %s883_s25, 1 }
   0xa   : > { %s1669_s26 = scalar_select %p1369_p1, 1, 0 }
   0xb   : > { %p1379_p4 = por %p1369_p1, %p54_p0  ;;  %p884_p5 = scmp.ge.s32.totalorder %s1295_s23, 1 }
   0xc   : > { %p1384_p6 = por %p183_p3, %p54_p0  ;;  %p190_p7 = scmp.lt.s32.totalorder %s1295_s23, 3 }
   0xd   : > { %s1671_s28 = scalar_select %p1379_p4, 1, 0 }
   0xe   : > { %s1672_s29 = scalar_select %p1384_p6, 1, 0 }
   0xf   : > { %p1389_p8 = pnand %p884_p5, %p190_p7  ;;  %s1297_s6 = smov [#allocation5]  }
  0x10   : > { %s206_s7 = sshll.u32 %s1297_s6, 4  ;;  %s1298_s9 = smov [#allocation7]   ;;  %s1393_s7 = int_to_ptr.vmem [resolvable:$true] %s206_s7 }
  0x11   : > { %p1048_p9 = pneg %p1389_p8  ;;  %s230_s10 = sshll.u32 %s1298_s9, 4  ;;  %s1404_s10 = int_to_ptr.vmem [resolvable:$true] %s230_s10 }
  0x12   : > { %s1123_s13 = scalar_lea.hbm %s1659_s1, 8192 }
  0x13   : > { %p1400_p11 = pnand %p1048_p9, %p1369_p1  ;;  %p1124_p12 = scmp.ne.s32.totalorder %s1659_s1, %s1123_s13 }
  0x14   : > { %p1130_p5 = scmp.lt.u32.totalorder %s1123_s13, %s1659_s1 }
  0x15   : > { %p1125_p13 = pneg %p1400_p11 }
  0x17   : > { %p1126_p0 = pnand %p1125_p13, %p1124_p12 }
  0x19   : > { %p1127_p3 = pneg %p1126_p0 }
  0x1b   : > { %p1132_p7 = pnand %p1130_p5, %p1127_p3 }
  0x1d   : > { %1135 = shalt.err (!%p1132_p7)
}
  0x1e   : > { %s1136_s24 = scalar_lea.vmem %s1393_s7, 8192  ;;  %p1144_p1 = scmp.lt.s32.totalorder %s1393_s7, %s1393_s7 }
  0x1f   : > { %p1137_p9 = scmp.ne.s32.totalorder %s1393_s7, %s1136_s24  ;;  %p1145_p12 = scmp.lt.s32.totalorder %s1136_s24, %s1136_s24 }
  0x21   : > { %p1139_p10 = pnand %p1137_p9, %p1125_p13  ;;  %p1146_p0 = por %p1145_p12, %p1144_p1 }
  0x23   : > { %p1140_p6 = pneg %p1139_p10 }
  0x25   : > { %p1147_p4 = pnand %p1146_p0, %p1140_p6 }
  0x27   : > { %1150 = shalt.err (!%p1147_p4)
}
  0x28   : > { %s1667_s25 = smov 256   ;;  %s1300_s6 = smov 16  }
  0x29   : > { %1051 = dma.hbm_to_vmem [thread:$0]  (!%p1400_p11), %s1659_s1, 8192, %s1393_s7, [#allocation6], %s1667_s25, %s1667_s25, %s1300_s6  }
  0x2a   : > { %s1151_s14 = scalar_lea.hbm %s1661_s3, 8192 }
  0x2b   : > { %p1152_p1 = scmp.ne.s32.totalorder %s1661_s3, %s1151_s14  ;;  %p1158_p10 = scmp.lt.u32.totalorder %s1151_s14, %s1661_s3 }
  0x2d   : > { %p1154_p4 = pnand %p1152_p1, %p1125_p13 }
  0x2f   : > { %p1155_p6 = pneg %p1154_p4 }
  0x31   : > { %p1160_p3 = pnand %p1158_p10, %p1155_p6 }
  0x33   : > { %1163 = shalt.err (!%p1160_p3)
}
  0x34   : > { %s1164_s7 = scalar_lea.vmem %s1404_s10, 8192  ;;  %p1172_p12 = scmp.lt.s32.totalorder %s1404_s10, %s1404_s10 }
  0x35   : > { %p1165_p5 = scmp.ne.s32.totalorder %s1404_s10, %s1164_s7  ;;  %p1173_p0 = scmp.lt.s32.totalorder %s1164_s7, %s1164_s7 }
  0x37   : > { %p1167_p7 = pnand %p1165_p5, %p1125_p13  ;;  %p1174_p1 = por %p1173_p0, %p1172_p12 }
  0x39   : > { %p1168_p9 = pneg %p1167_p7 }
  0x3b   : > { %p1175_p4 = pnand %p1174_p1, %p1168_p9 }
  0x3d   : > { %1178 = shalt.err (!%p1175_p4)
}
  0x3e   : > { %1054 = dma.hbm_to_vmem [thread:$0]  (!%p1400_p11), %s1661_s3, 8192, %s1404_s10, [#allocation6], %s1667_s25, %s1667_s25, %s1300_s6  }
  0x3f   : > { %s34_s8 = sadd.s32 1, %s1291_s22  ;;  %s41_s12 = sadd.s32 1, %s1283_s20 }
  0x40   : > { %p36_p13 = scmp.ge.s32.totalorder %s34_s8, 2  ;;  %p48_p6 = scmp.ne.s32.totalorder %s1283_s20, %s1279_s19 }
  0x41   : > { %p49_p10 = scmp.eq.s32.totalorder %s1295_s23, 0  ;;  %p1065_p3 = scmp.lt.s32.totalorder %s1295_s23, 2 }
  0x42   : > { %s1689_s8 = smov (%p36_p13, %s34_s8), 0  ;;  %p1474_p7 = por %p1373_p2, %p48_p6 }
  0x43   : > { %p50_p5 = por %p49_p10, %p48_p6  ;;  %s38_s14 = ssub.s32 %s1291_s22, %s1689_s8 }
  0x44   : > { %s1675_s13 = scalar_select %p1474_p7, 1, 0 }
  0x45   : > { %s247_s15 = sand.u32 1, %s1283_s20   ;;  %p39_p9 = scmp.eq.s32.totalorder %s38_s14, 0 }
  0x46   : > { %s889_s10 = sshll.u32 %s247_s15, 7  ;;  %s905_s16 = sshll.u32 %s1291_s22, 11 }
  0x47   : > { %s1483_s17 = scalar_select %p39_p9, %s1283_s20, %s41_s12  }
  0x48   : > { %s1488_s9 = scalar_lea.hbm %s1658_s0, %s905_s16  ;;  %s251_s27 = scalar_lea.vmem [#allocation2], %s889_s10 }
  0x49   : > { %s259_s11 = sshll.u32 %s251_s27, 4  ;;  %p1492_p2 = pnand %p1065_p3, %p50_p5  ;;  %s1496_s11 = int_to_ptr.vmem [resolvable:$true] %s259_s11 }
  0x4a   : > { %s1498_s12 = scalar_lea.sflag [#allocation3], %s247_s15  ;;  %s1179_s14 = scalar_lea.hbm %s1488_s9, 2048 }
  0x4b   : > { %p1180_p11 = scmp.ne.s32.totalorder %s1488_s9, %s1179_s14  ;;  %p1181_p12 = pneg %p1492_p2 }
  0x4c   : > { %s1184_s24 = scalar_lea.hbm %s1658_s0, 4096  ;;  %p1185_p4 = scmp.lt.u32.totalorder %s1488_s9, %s1658_s0 }
  0x4d   : > { %p1182_p0 = pnand %p1181_p12, %p1180_p11  ;;  %p1186_p13 = scmp.lt.u32.totalorder %s1184_s24, %s1179_s14 }
  0x4e   : > { %p1188_p10 = scmp.lt.u32.totalorder %s1179_s14, %s1488_s9 }
  0x4f   : > { %p1183_p1 = pneg %p1182_p0  ;;  %p1187_p6 = por %p1186_p13, %p1185_p4 }
  0x51   : > { %p1189_p3 = por %p1188_p10, %p1187_p6 }
  0x53   : > { %p1190_p5 = pnand %p1189_p3, %p1183_p1 }
  0x55   : > { %1193 = shalt.err (!%p1190_p5)
}
  0x56   : > { %s1194_s15 = scalar_lea.vmem %s1496_s11, 2048  ;;  %s1301_s10 = smov [#allocation2]  }
  0x57   : > { %p1195_p9 = scmp.ne.s32.totalorder %s1496_s11, %s1194_s15  ;;  %s1199_s16 = sshll.u32 %s1301_s10, 4  ;;  %s1200_s16 = int_to_ptr.vmem [resolvable:$false] %s1199_s16 }
  0x58   : > { %s1201_s7 = scalar_lea.vmem %s1200_s16, 4096  ;;  %p1202_p7 = scmp.lt.s32.totalorder %s1496_s11, %s1200_s16 }
  0x59   : > { %p1197_p11 = pnand %p1195_p9, %p1181_p12  ;;  %p1203_p4 = scmp.lt.s32.totalorder %s1201_s7, %s1194_s15 }
  0x5b   : > { %p1198_p0 = pneg %p1197_p11  ;;  %p1204_p13 = por %p1203_p4, %p1202_p7 }
  0x5d   : > { %p1205_p6 = pnand %p1204_p13, %p1198_p0 }
  0x5f   : > { %1208 = shalt.err (!%p1205_p6)
}
  0x60   : > { %s1677_s14 = smov 256   ;;  %271 = sbr.rel (%p1389_p8) target bundleno = 714 (0x2ca), region = 40 }
  0x61   : > { %1058 = dma.hbm_to_vmem [thread:$0]  (!%p1492_p2), %s1488_s9, 2048, %s1496_s11, %s1498_s12, %s1677_s14, %s1677_s14, %s1300_s6  }
  0x62   : > { %s1532_s24 = sand.u32 (!%p1389_p8), 1, %s1279_s19   ;;  %p1678_p7 = scmp.ne.s32.totalorder (!%p1389_p8), %s1671_s28, 0 }
  0x63   : > { %s894_s27 = sshll.u32 (!%p1389_p8), %s1532_s24, 7  ;;  %s274_s15 = scalar_lea.sflag (!%p1389_p8), [#allocation3], %s1532_s24 }
  0x64   : > { %s1538_s25 = scalar_lea.vmem (!%p1389_p8), [#allocation2], %s894_s27 }
  0x67   : > { %1262 = dma.done.wait (%p1678_p7), %s274_s15, 2048  }
  0x68   : > { %1264 = vsyncadd (%p1678_p7), %s274_s15, 4294965248  ;;  %p1679_p2 = scmp.ne.s32.totalorder %s1669_s26, 0 }
  0x6a   : > { %1266 = dma.done.wait (%p1679_p2), [#allocation6], 16384  }
  0x6b   : > { %1268 = vsyncadd (%p1679_p2), [#allocation6], 4294950912  ;;  %v342_v0 = vld [vmem:[#allocation5 + $0x8] sm:$0xff]  ;;  %v344_v1 = vld [vmem:[#allocation5 + $0x18] sm:$0xff]  ;;  %s1584_s9 = scalar_lea.vmem [#allocation8], %s894_s27  ;;  %s907_s11 = sshll.u32 %s1287_s21, 11 }
  0x6c   : > { %v341_v2 = vld [vmem:[#allocation5] sm:$0xff]  ;;  %v908_v3 = vpack.c.bf16 %v344_v1, %v342_v0  ;;  %v343_v4 = vld [vmem:[#allocation5 + $0x10] sm:$0xff]  ;;  %v346_v5 = vld [vmem:[#allocation5 + $0x28] sm:$0xff]  ;;  %s766_s12 = sshll.u32 %s1584_s9, 4  ;;  %s1605_s7 = scalar_lea.hbm %s1663_s5, %s907_s11  ;;  %s1607_s12 = int_to_ptr.vmem [resolvable:$true] %s766_s12 }
  0x6d   : > { %v348_v6 = vld [vmem:[#allocation5 + $0x38] sm:$0xff]  ;;  %v910_v7 = vpack.c.bf16 %v343_v4, %v341_v2  ;;  %v345_v9 = vld [vmem:[#allocation5 + $0x20] sm:$0xff]  ;;  %v347_v10 = vld [vmem:[#allocation5 + $0x30] sm:$0xff]  ;;  %s752_s21 = scalar_lea.sflag [#allocation4], %s1532_s24  ;;  %s1209_s14 = scalar_lea.vmem %s1607_s12, 2048 }
  0x6e   : > { %v912_v8 = vpack.c.bf16 %v348_v6, %v346_v5  ;;  %909 = vmatprep.subr.bf16.mxu0 %v908_v3  ;;  %v350_v11 = vld [vmem:[#allocation5 + $0x48] sm:$0xff]  ;;  %v352_v12 = vld [vmem:[#allocation5 + $0x58] sm:$0xff]  ;;  %v914_v13 = vpack.c.bf16 %v347_v10, %v345_v9  ;;  %v349_v15 = vld [vmem:[#allocation5 + $0x40] sm:$0xff]  ;;  %p1210_p8 = scmp.ne.s32.totalorder %s1607_s12, %s1209_s14  ;;  %p1680_p12 = scmp.ne.s32.totalorder %s1675_s13, 0 }
  0x6f   : > { %911 = vmatpush1.bf16.xpose.msra.mxu0 %v910_v7  ;;  %v916_v14 = vpack.c.bf16 %v352_v12, %v350_v11  ;;  %v351_v16 = vld [vmem:[#allocation5 + $0x50] sm:$0xff]  ;;  %v354_v17 = vld [vmem:[#allocation5 + $0x68] sm:$0xff]  ;;  %v356_v18 = vld [vmem:[#allocation5 + $0x78] sm:$0xff]  ;;  %s1302_s27 = smov [#allocation8]  }
  0x70   : > { %913 = vmatprep.subr.bf16.mxu0 %v912_v8  ;;  %v918_v19 = vpack.c.bf16 %v351_v16, %v349_v15  ;;  %v920_v20 = vpack.c.bf16 %v356_v18, %v354_v17  ;;  %v353_v21 = vld [vmem:[#allocation5 + $0x60] sm:$0xff]  ;;  %v355_v22 = vld [vmem:[#allocation5 + $0x70] sm:$0xff]  ;;  %v326_v23 = vld [vmem:[%s1538_s25 + $0x8] sm:$0xff]  ;;  %p1211_p1 = pnand %p1210_p8, %p1680_p12  ;;  %s1213_s15 = sshll.u32 %s1302_s27, 4  ;;  %s1214_s15 = int_to_ptr.vmem [resolvable:$false] %s1213_s15 }
  0x71   : > { %v358_v24 = vld [vmem:[#allocation5 + $0x88] sm:$0xff]  ;;  %v360_v25 = vld [vmem:[#allocation5 + $0x98] sm:$0xff]  ;;  %481 = vmatprep.mubr.f32.mxu0 %v326_v23  ;;  %v922_v26 = vpack.c.bf16 %v355_v22, %v353_v21  ;;  %v357_v28 = vld [vmem:[#allocation5 + $0x80] sm:$0xff]  ;;  %p1216_p3 = scmp.lt.s32.totalorder %s1607_s12, %s1214_s15 }
  0x72   : > { %v924_v27 = vpack.c.bf16 %v360_v25, %v358_v24  ;;  %v359_v29 = vld [vmem:[#allocation5 + $0x90] sm:$0xff]  ;;  %v362_v30 = vld [vmem:[#allocation5 + $0xa8] sm:$0xff]  ;;  %v364_v31 = vld [vmem:[#allocation5 + $0xb8] sm:$0xff]  ;;  %p1212_p10 = pneg %p1211_p1 }
  0x73   : > { %v547_v32 = vld [vmem:[#allocation7 + $0x8] sm:$0xff]  ;;  %v549_v33 = vld [vmem:[#allocation7 + $0x18] sm:$0xff]  ;;  %v546_v34 = vld [vmem:[#allocation7] sm:$0xff]  ;;  %v926_v35 = vpack.c.bf16 %v359_v29, %v357_v28  ;;  %v928_v40 = vpack.c.bf16 %v364_v31, %v362_v30 }
  0x74   : > { %v972_v36 = vpack.c.bf16 %v549_v33, %v547_v32  ;;  %v548_v37 = vld [vmem:[#allocation7 + $0x10] sm:$0xff]  ;;  %v551_v38 = vld [vmem:[#allocation7 + $0x28] sm:$0xff]  ;;  %v553_v39 = vld [vmem:[#allocation7 + $0x38] sm:$0xff] }
  0x75   : > { %v974_v41 = vpack.c.bf16 %v548_v37, %v546_v34  ;;  %v976_v42 = vpack.c.bf16 %v553_v39, %v551_v38  ;;  %v361_v43 = vld [vmem:[#allocation5 + $0xa0] sm:$0xff]  ;;  %v552_v45 = vld [vmem:[#allocation7 + $0x30] sm:$0xff]  ;;  %v555_v47 = vld [vmem:[#allocation7 + $0x48] sm:$0xff] }
  0x76   : > { %973 = vmatprep.subr.bf16.mxu1 %v972_v36  ;;  %v550_v44 = vld [vmem:[#allocation7 + $0x20] sm:$0xff]  ;;  %v363_v46 = vld [vmem:[#allocation5 + $0xb0] sm:$0xff]  ;;  %v557_v48 = vld [vmem:[#allocation7 + $0x58] sm:$0xff] }
  0x77   : > { %915 = vmatpush1.bf16.xpose.msra.mxu0 %v914_v13  ;;  %975 = vmatpush1.bf16.xpose.msra.mxu1 %v974_v41  ;;  %v366_v49 = vld [vmem:[#allocation5 + $0xc8] sm:$0xff]  ;;  %v368_v50 = vld [vmem:[#allocation5 + $0xd8] sm:$0xff]  ;;  %v978_v51 = vpack.c.bf16 %v552_v45, %v550_v44  ;;  %v930_v52 = vpack.c.bf16 %v363_v46, %v361_v43  ;;  %v980_v53 = vpack.c.bf16 %v557_v48, %v555_v47  ;;  %v365_v55 = vld [vmem:[#allocation5 + $0xc0] sm:$0xff] }
  0x78   : > { %917 = vmatprep.subr.bf16.mxu0 %v916_v14  ;;  %977 = vmatprep.subr.bf16.mxu1 %v976_v42  ;;  %v932_v54 = vpack.c.bf16 %v368_v50, %v366_v49  ;;  %v554_v56 = vld [vmem:[#allocation7 + $0x40] sm:$0xff]  ;;  %v556_v57 = vld [vmem:[#allocation7 + $0x50] sm:$0xff]  ;;  %v559_v59 = vld [vmem:[#allocation7 + $0x68] sm:$0xff] }
  0x79   : > { %v367_v58 = vld [vmem:[#allocation5 + $0xd0] sm:$0xff]  ;;  %v561_v60 = vld [vmem:[#allocation7 + $0x78] sm:$0xff]  ;;  %v370_v61 = vld [vmem:[#allocation5 + $0xe8] sm:$0xff]  ;;  %v982_v63 = vpack.c.bf16 %v556_v57, %v554_v56 }
  0x7a   : > { %v372_v62 = vld [vmem:[#allocation5 + $0xf8] sm:$0xff]  ;;  %v934_v0 = vpack.c.bf16 %v367_v58, %v365_v55  ;;  %v984_v1 = vpack.c.bf16 %v561_v60, %v559_v59  ;;  %v369_v3 = vld [vmem:[#allocation5 + $0xe0] sm:$0xff]  ;;  %v560_v5 = vld [vmem:[#allocation7 + $0x70] sm:$0xff] }
  0x7b   : > { %v936_v2 = vpack.c.bf16 %v372_v62, %v370_v61  ;;  %v558_v4 = vld [vmem:[#allocation7 + $0x60] sm:$0xff]  ;;  %v371_v6 = vld [vmem:[#allocation5 + $0xf0] sm:$0xff]  ;;  %v563_v7 = vld [vmem:[#allocation7 + $0x88] sm:$0xff] }
  0x7c   : > { %v565_v8 = vld [vmem:[#allocation7 + $0x98] sm:$0xff]  ;;  %v374_v9 = vld [vmem:[#allocation5 + $0x108] sm:$0xff]  ;;  %v986_v11 = vpack.c.bf16 %v560_v5, %v558_v4  ;;  %v938_v12 = vpack.c.bf16 %v371_v6, %v369_v3  ;;  %v373_v15 = vld [vmem:[#allocation5 + $0x100] sm:$0xff] }
  0x7d   : > { %v376_v10 = vld [vmem:[#allocation5 + $0x118] sm:$0xff]  ;;  %v988_v13 = vpack.c.bf16 %v565_v8, %v563_v7  ;;  %v562_v16 = vld [vmem:[#allocation7 + $0x80] sm:$0xff]  ;;  %v564_v17 = vld [vmem:[#allocation7 + $0x90] sm:$0xff] }
  0x7e   : > { %v940_v14 = vpack.c.bf16 %v376_v10, %v374_v9  ;;  %v375_v18 = vld [vmem:[#allocation5 + $0x110] sm:$0xff]  ;;  %v378_v21 = vld [vmem:[#allocation5 + $0x128] sm:$0xff]  ;;  %v380_v22 = vld [vmem:[#allocation5 + $0x138] sm:$0xff]  ;;  %v990_v23 = vpack.c.bf16 %v564_v17, %v562_v16 }
  0x7f   : > { %919 = vmatpush1.bf16.xpose.msra.mxu0 %v918_v19  ;;  %979 = vmatpush1.bf16.xpose.msra.mxu1 %v978_v51  ;;  %v567_v19 = vld [vmem:[#allocation7 + $0xa8] sm:$0xff]  ;;  %v942_v24 = vpack.c.bf16 %v375_v18, %v373_v15  ;;  %v566_v28 = vld [vmem:[#allocation7 + $0xa0] sm:$0xff]  ;;  %v568_v29 = vld [vmem:[#allocation7 + $0xb0] sm:$0xff] }
  0x80   : > { %921 = vmatprep.subr.bf16.mxu0 %v920_v20  ;;  %981 = vmatprep.subr.bf16.mxu1 %v980_v53  ;;  %v569_v20 = vld [vmem:[#allocation7 + $0xb8] sm:$0xff]  ;;  %v379_v30 = vld [vmem:[#allocation5 + $0x130] sm:$0xff]  ;;  %v571_v31 = vld [vmem:[#allocation7 + $0xc8] sm:$0xff] }
  0x81   : > { %v992_v25 = vpack.c.bf16 %v569_v20, %v567_v19  ;;  %v573_v32 = vld [vmem:[#allocation7 + $0xd8] sm:$0xff]  ;;  %v382_v33 = vld [vmem:[#allocation5 + $0x148] sm:$0xff]  ;;  %v381_v39 = vld [vmem:[#allocation5 + $0x140] sm:$0xff] }
  0x82   : > { %v384_v34 = vld [vmem:[#allocation5 + $0x158] sm:$0xff]  ;;  %v996_v37 = vpack.c.bf16 %v573_v32, %v571_v31  ;;  %v572_v41 = vld [vmem:[#allocation7 + $0xd0] sm:$0xff]  ;;  %v575_v43 = vld [vmem:[#allocation7 + $0xe8] sm:$0xff] }
  0x83   : > { %v948_v38 = vpack.c.bf16 %v384_v34, %v382_v33  ;;  %v383_v42 = vld [vmem:[#allocation5 + $0x150] sm:$0xff]  ;;  %v577_v44 = vld [vmem:[#allocation7 + $0xf8] sm:$0xff]  ;;  %v386_v45 = vld [vmem:[#allocation5 + $0x168] sm:$0xff] }
  0x84   : > { %v388_v46 = vld [vmem:[#allocation5 + $0x178] sm:$0xff]  ;;  %v950_v48 = vpack.c.bf16 %v383_v42, %v381_v39  ;;  %v1000_v49 = vpack.c.bf16 %v577_v44, %v575_v43  ;;  %v385_v51 = vld [vmem:[#allocation5 + $0x160] sm:$0xff]  ;;  %v576_v53 = vld [vmem:[#allocation7 + $0xf0] sm:$0xff] }
  0x85   : > { %v952_v50 = vpack.c.bf16 %v388_v46, %v386_v45  ;;  %v579_v55 = vld [vmem:[#allocation7 + $0x108] sm:$0xff]  ;;  %v581_v56 = vld [vmem:[#allocation7 + $0x118] sm:$0xff]  ;;  %v594_v44 = vld [vmem:[#allocation7 + $0x180] sm:$0xff] }
  0x86   : > { %v390_v57 = vld [vmem:[#allocation5 + $0x188] sm:$0xff]  ;;  %v392_v58 = vld [vmem:[#allocation5 + $0x198] sm:$0xff]  ;;  %v1004_v61 = vpack.c.bf16 %v581_v56, %v579_v55  ;;  %v596_v45 = vld [vmem:[#allocation7 + $0x190] sm:$0xff] }
  0x87   : > { %923 = vmatpush1.bf16.xpose.msra.mxu0 %v922_v26  ;;  %983 = vmatpush1.bf16.xpose.msra.mxu1 %v982_v63  ;;  %v944_v26 = vpack.c.bf16 %v380_v22, %v378_v21  ;;  %v956_v62 = vpack.c.bf16 %v392_v58, %v390_v57  ;;  %v389_v63 = vld [vmem:[#allocation5 + $0x180] sm:$0xff]  ;;  %v583_v3 = vld [vmem:[#allocation7 + $0x128] sm:$0xff]  ;;  %v585_v4 = vld [vmem:[#allocation7 + $0x138] sm:$0xff] }
  0x88   : > { %925 = vmatprep.subr.bf16.mxu0 %v924_v27  ;;  %985 = vmatprep.subr.bf16.mxu1 %v984_v1  ;;  %v377_v27 = vld [vmem:[#allocation5 + $0x120] sm:$0xff]  ;;  %v580_v1 = vld [vmem:[#allocation7 + $0x110] sm:$0xff]  ;;  %v394_v5 = vld [vmem:[#allocation5 + $0x1a8] sm:$0xff]  ;;  %v1008_v9 = vpack.c.bf16 %v585_v4, %v583_v3 }
  0x89   : > { %v946_v36 = vpack.c.bf16 %v379_v30, %v377_v27  ;;  %v396_v6 = vld [vmem:[#allocation5 + $0x1b8] sm:$0xff]  ;;  %v587_v15 = vld [vmem:[#allocation7 + $0x148] sm:$0xff] }
  0x8a   : > { %v960_v10 = vpack.c.bf16 %v396_v6, %v394_v5  ;;  %v589_v16 = vld [vmem:[#allocation7 + $0x158] sm:$0xff]  ;;  %v398_v17 = vld [vmem:[#allocation5 + $0x1c8] sm:$0xff]  ;;  %v333_v5 = vld [vmem:[%s1538_s25 + $0x40] sm:$0xff] }
  0x8b   : > { %v400_v18 = vld [vmem:[#allocation5 + $0x1d8] sm:$0xff]  ;;  %v1012_v21 = vpack.c.bf16 %v589_v16, %v587_v15  ;;  %v591_v27 = vld [vmem:[#allocation7 + $0x168] sm:$0xff]  ;;  %v407_v16 = vlaneseq }
  0x8c   : > { %v964_v22 = vpack.c.bf16 %v400_v18, %v398_v17  ;;  %v404_v30 = vld [vmem:[#allocation5 + $0x1f8] sm:$0xff]  ;;  %v595_v39 = vld [vmem:[#allocation7 + $0x188] sm:$0xff] }
  0x8d   : > { %v599_v46 = vld [vmem:[#allocation7 + $0x1a8] sm:$0xff]  ;;  %v605_v57 = vld [vmem:[#allocation7 + $0x1d8] sm:$0xff]  ;;  %v1564_v17 = vshrl.u32 %v407_v16, 7 }
  0x8e   : > { %v330_v55 = vld [vmem:[%s1538_s25 + $0x28] sm:$0xff]  ;;  %v609_v3 = vld [vmem:[#allocation7 + $0x1f8] sm:$0xff] }
  0x8f   : > { %927 = vmatpush1.bf16.xpose.msra.mxu0 %v926_v35  ;;  %987 = vmatpush1.bf16.xpose.msra.mxu1 %v986_v11  ;;  %v994_v35 = vpack.c.bf16 %v568_v29, %v566_v28  ;;  %v393_v11 = vld [vmem:[#allocation5 + $0x1a0] sm:$0xff]  ;;  %v593_v28 = vld [vmem:[#allocation7 + $0x178] sm:$0xff]  ;;  %v402_v29 = vld [vmem:[#allocation5 + $0x1e8] sm:$0xff]  ;;  %v409_v18 = vsub.s32 0, %v1564_v17 }
  0x90   : > { %929 = vmatprep.subr.bf16.mxu0 %v928_v40  ;;  %989 = vmatprep.subr.bf16.mxu1 %v988_v13  ;;  %v570_v40 = vld [vmem:[#allocation7 + $0xc0] sm:$0xff]  ;;  %v584_v13 = vld [vmem:[#allocation7 + $0x130] sm:$0xff]  ;;  %v1016_v33 = vpack.c.bf16 %v593_v28, %v591_v27  ;;  %v968_v34 = vpack.c.bf16 %v404_v30, %v402_v29  ;;  %v603_v56 = vld [vmem:[#allocation7 + $0x1c8] sm:$0xff] }
  0x91   : > { %v998_v47 = vpack.c.bf16 %v572_v41, %v570_v40  ;;  %v597_v40 = vld [vmem:[#allocation7 + $0x198] sm:$0xff] }
  0x92   : > { %v1020_v43 = vpack.c.bf16 %v597_v40, %v595_v39 }
  0x97   : > { %931 = vmatpush1.bf16.xpose.msra.mxu0 %v930_v52  ;;  %991 = vmatpush1.bf16.xpose.msra.mxu1 %v990_v23  ;;  %v574_v52 = vld [vmem:[#allocation7 + $0xe0] sm:$0xff] }
  0x98   : > { %933 = vmatprep.subr.bf16.mxu0 %v932_v54  ;;  %993 = vmatprep.subr.bf16.mxu1 %v992_v25  ;;  %v387_v54 = vld [vmem:[#allocation5 + $0x170] sm:$0xff]  ;;  %v1002_v59 = vpack.c.bf16 %v576_v53, %v574_v52  ;;  %v397_v23 = vld [vmem:[#allocation5 + $0x1c0] sm:$0xff] }
  0x99   : > { %v954_v60 = vpack.c.bf16 %v387_v54, %v385_v51  ;;  %v588_v25 = vld [vmem:[#allocation7 + $0x150] sm:$0xff]  ;;  %v328_v51 = vld [vmem:[%s1538_s25 + $0x18] sm:$0xff]  ;;  %v598_v53 = vld [vmem:[#allocation7 + $0x1a0] sm:$0xff] }
  0x9a   : > { %v327_v52 = vld [vmem:[%s1538_s25 + $0x10] sm:$0xff] }
  0x9b   : > { %v600_v54 = vld [vmem:[#allocation7 + $0x1b0] sm:$0xff] }
  0x9c   : > { %v1026_v58 = vpack.c.bf16 %v600_v54, %v598_v53 }
  0x9f   : > { %935 = vmatpush1.bf16.xpose.msra.mxu0 %v934_v0  ;;  %995 = vmatpush1.bf16.xpose.msra.mxu1 %v994_v35  ;;  %v578_v0 = vld [vmem:[#allocation7 + $0x100] sm:$0xff] }
  0xa0   : > { %937 = vmatprep.subr.bf16.mxu0 %v936_v2  ;;  %997 = vmatprep.subr.bf16.mxu1 %v996_v37  ;;  %v391_v2 = vld [vmem:[#allocation5 + $0x190] sm:$0xff]  ;;  %v1006_v7 = vpack.c.bf16 %v580_v1, %v578_v0  ;;  %v401_v35 = vld [vmem:[#allocation5 + $0x1e0] sm:$0xff]  ;;  %v334_v1 = vld [vmem:[%s1538_s25 + $0x48] sm:$0xff] }
  0xa1   : > { %v958_v8 = vpack.c.bf16 %v391_v2, %v389_v63  ;;  %v592_v37 = vld [vmem:[#allocation7 + $0x170] sm:$0xff]  ;;  %v602_v63 = vld [vmem:[#allocation7 + $0x1c0] sm:$0xff]  ;;  %v607_v2 = vld [vmem:[#allocation7 + $0x1e8] sm:$0xff] }
  0xa2   : > { %v604_v0 = vld [vmem:[#allocation7 + $0x1d0] sm:$0xff]  ;;  %v1032_v6 = vpack.c.bf16 %v609_v3, %v607_v2 }
  0xa3   : > { %v1030_v4 = vpack.c.bf16 %v604_v0, %v602_v63 }
  0xa7   : > { %939 = vmatpush1.bf16.xpose.msra.mxu0 %v938_v12  ;;  %999 = vmatpush1.bf16.xpose.msra.mxu1 %v998_v47  ;;  %v582_v12 = vld [vmem:[#allocation7 + $0x120] sm:$0xff]  ;;  %v601_v47 = vld [vmem:[#allocation7 + $0x1b8] sm:$0xff] }
  0xa8   : > { %941 = vmatprep.subr.bf16.mxu0 %v940_v14  ;;  %1001 = vmatprep.subr.bf16.mxu1 %v1000_v49  ;;  %v395_v14 = vld [vmem:[#allocation5 + $0x1b0] sm:$0xff]  ;;  %v1010_v19 = vpack.c.bf16 %v584_v13, %v582_v12  ;;  %v325_v49 = vld [vmem:[%s1538_s25] sm:$0xff] }
  0xa9   : > { %v962_v20 = vpack.c.bf16 %v395_v14, %v393_v11  ;;  %v340_v11 = vld [vmem:[%s1538_s25 + $0x78] sm:$0xff]  ;;  %v339_v12 = vld [vmem:[%s1538_s25 + $0x70] sm:$0xff]  ;;  %v606_v13 = vld [vmem:[#allocation7 + $0x1e0] sm:$0xff] }
  0xaa   : > { %v608_v14 = vld [vmem:[#allocation7 + $0x1f0] sm:$0xff] }
  0xab   : > { %v1034_v15 = vpack.c.bf16 %v608_v14, %v606_v13 }
  0xaf   : > { %943 = vmatpush1.bf16.xpose.msra.mxu0 %v942_v24  ;;  %1003 = vmatpush1.bf16.xpose.msra.mxu1 %v1002_v59  ;;  %v586_v24 = vld [vmem:[#allocation7 + $0x140] sm:$0xff] }
  0xb0   : > { %945 = vmatprep.subr.bf16.mxu0 %v944_v26  ;;  %1005 = vmatprep.subr.bf16.mxu1 %v1004_v61  ;;  %v399_v26 = vld [vmem:[#allocation5 + $0x1d0] sm:$0xff]  ;;  %v1014_v31 = vpack.c.bf16 %v588_v25, %v586_v24  ;;  %v329_v59 = vld [vmem:[%s1538_s25 + $0x20] sm:$0xff]  ;;  %v332_v61 = vld [vmem:[%s1538_s25 + $0x38] sm:$0xff] }
  0xb1   : > { %v966_v32 = vpack.c.bf16 %v399_v26, %v397_v23 }
  0xb7   : > { %947 = vmatpush1.bf16.xpose.msra.mxu0 %v946_v36  ;;  %1007 = vmatpush1.bf16.xpose.msra.mxu1 %v1006_v7  ;;  %v590_v36 = vld [vmem:[#allocation7 + $0x160] sm:$0xff]  ;;  %v336_v7 = vld [vmem:[%s1538_s25 + $0x58] sm:$0xff] }
  0xb8   : > { %949 = vmatprep.subr.bf16.mxu0 %v948_v38  ;;  %1009 = vmatprep.subr.bf16.mxu1 %v1008_v9  ;;  %v403_v38 = vld [vmem:[#allocation5 + $0x1f0] sm:$0xff]  ;;  %v1018_v41 = vpack.c.bf16 %v592_v37, %v590_v36  ;;  %v338_v9 = vld [vmem:[%s1538_s25 + $0x68] sm:$0xff] }
  0xb9   : > { %v970_v42 = vpack.c.bf16 %v403_v38, %v401_v35 }
  0xbf   : > { %951 = vmatpush1.bf16.xpose.msra.mxu0 %v950_v48  ;;  %1011 = vmatpush1.bf16.xpose.msra.mxu1 %v1010_v19  ;;  %v1022_v48 = vpack.c.bf16 %v596_v45, %v594_v44  ;;  %v405_v19 = vld [vmem:[%s1660_s2] sm:$0x3] }
  0xc0   : > { %953 = vmatprep.subr.bf16.mxu0 %v952_v50  ;;  %1013 = vmatprep.subr.bf16.mxu1 %v1012_v21  ;;  %v1024_v50 = vpack.c.bf16 %v601_v47, %v599_v46  ;;  %v410_v21 = vrot.slane %v405_v19, %v409_v18 }
  0xc7   : > { %955 = vmatpush1.bf16.xpose.msra.mxu0 %v954_v60  ;;  %1015 = vmatpush1.bf16.xpose.msra.mxu1 %v1014_v31  ;;  %v1028_v60 = vpack.c.bf16 %v605_v57, %v603_v56 }
  0xc8   : > { %957 = vmatprep.subr.bf16.mxu0 %v956_v62  ;;  %1017 = vmatprep.subr.bf16.mxu1 %v1016_v33  ;;  %v331_v62 = vld [vmem:[%s1538_s25 + $0x30] sm:$0xff] }
  0xcf   : > { %959 = vmatpush1.bf16.xpose.msra.mxu0 %v958_v8  ;;  %1019 = vmatpush1.bf16.xpose.msra.mxu1 %v1018_v41  ;;  %v335_v8 = vld [vmem:[%s1538_s25 + $0x50] sm:$0xff] }
  0xd0   : > { %961 = vmatprep.subr.bf16.mxu0 %v960_v10  ;;  %1021 = vmatprep.subr.bf16.mxu1 %v1020_v43  ;;  %v337_v10 = vld [vmem:[%s1538_s25 + $0x60] sm:$0xff]  ;;  %s1215_s25 = scalar_lea.vmem %s1214_s15, 4096 }
  0xd1   : > { %p1217_p5 = scmp.lt.s32.totalorder %s1215_s25, %s1209_s14 }
  0xd3   : > { %p1218_p9 = por %p1217_p5, %p1216_p3 }
  0xd5   : > { %p1219_p11 = pnand %p1218_p9, %p1212_p10 }
  0xd7   : > { %963 = vmatpush1.bf16.xpose.msra.mxu0 %v962_v20  ;;  %1023 = vmatpush1.bf16.xpose.msra.mxu1 %v1022_v48  ;;  %v413_v20 = vsub.s32 1, %v1564_v17 }
  0xd8   : > { %965 = vmatprep.subr.bf16.mxu0 %v964_v22  ;;  %1025 = vmatprep.subr.bf16.mxu1 %v1024_v50 }
  0xd9   : > { %v414_v22 = vrot.slane %v405_v19, %v413_v20 }
  0xdf   : > { %967 = vmatpush1.bf16.xpose.msra.mxu0 %v966_v32  ;;  %1027 = vmatpush1.bf16.xpose.msra.mxu1 %v1026_v58 }
  0xe0   : > { %969 = vmatprep.subr.bf16.mxu0 %v968_v34  ;;  %1029 = vmatprep.subr.bf16.mxu1 %v1028_v60 }
  0xe7   : > { %971 = vmatpush1.bf16.xpose.msra.mxu0 %v970_v42  ;;  %1031 = vmatpush1.bf16.xpose.msra.mxu1 %v1030_v4 }
  0xe8   : > { %1033 = vmatprep.subr.bf16.mxu1 %v1032_v6 }
  0xee   : > { %482 = vmatmul.mubr.f32.vlgmr.msra.gmra.mrb[0].mxu0 %v325_v49 }
  0xef   : > { %487 = vmatprep.mubr.f32.mxu0 %v328_v51  ;;  %1035 = vmatpush1.bf16.xpose.msra.mxu1 %v1034_v15 }
  0xf2   : > { %488 = vmatmul.mubr.f32.gmra.mrb[2].mxu0 %v327_v52 }
  0xf3   : > { %493 = vmatprep.mubr.f32.mxu0 %v330_v55 }
  0xf6   : > { %494 = vmatmul.mubr.f32.gmra.mrb[4].mxu0 %v329_v59 }
  0xf7   : > { %499 = vmatprep.mubr.f32.mxu0 %v332_v61 }
  0xfa   : > { %500 = vmatmul.mubr.f32.gmra.mrb[6].mxu0 %v331_v62 }
  0xfb   : > { %505 = vmatprep.mubr.f32.mxu0 %v334_v1 }
  0xfe   : > { %506 = vmatmul.mubr.f32.gmra.mrb[8].mxu0 %v333_v5 }
  0xff   : > { %511 = vmatprep.mubr.f32.mxu0 %v336_v7  ;;  %v610_v7 = vld [vmem:[%s1662_s4] sm:$0x3] }
 0x102   : > { %512 = vmatmul.mubr.f32.gmra.mrb[10].mxu0 %v335_v8  ;;  %v615_v8 = vrot.slane %v610_v7, %v409_v18 }
 0x103   : > { %517 = vmatprep.mubr.f32.mxu0 %v338_v9  ;;  %v619_v9 = vrot.slane %v610_v7, %v413_v20 }
 0x106   : > { %518 = vmatmul.mubr.f32.gmra.mrb[12].mxu0 %v337_v10 }
 0x107   : > { %523 = vmatprep.mubr.f32.mxu0 %v340_v11 }
 0x10a   : > { %524 = vmatmul.mubr.f32.gmra.mrb[14].mxu0 %v339_v12 }
 0x1c1   : > { %v483_v23 = vpop.f32.mrb[0].mxu0 }
 0x1c2   : > { %v484_v24 = vadd.f32 %v483_v23, %v410_v21  ;;  %v485_v25 = vpop.f32.mrb[1].mxu0 }
 0x1c3   : > { %v486_v26 = vadd.f32 %v485_v25, %v414_v22 }
 0x1c4   : > { %v530_v29 = vmax.f32 %v484_v24, 0.0 }
 0x1c5   : > { %v489_v27 = vpop.f32.mrb[2].mxu0  ;;  %v531_v28 = vmax.f32 %v486_v26, 0.0 }
 0x1c6   : > { %v490_v30 = vadd.f32 %v489_v27, %v410_v21  ;;  %v491_v31 = vpop.f32.mrb[3].mxu0 }
 0x1c7   : > { %v492_v32 = vadd.f32 %v491_v31, %v414_v22  ;;  %686 = vmatprep.mubr.f32.mxu1 %v531_v28 }
 0x1c8   : > { %687 = vmatmul.mubr.f32.vlgmr.msra.gmra.mrb[0].mxu1 %v530_v29  ;;  %v532_v35 = vmax.f32 %v490_v30, 0.0 }
 0x1c9   : > { %v533_v33 = vmax.f32 %v492_v32, 0.0  ;;  %v495_v34 = vpop.f32.mrb[4].mxu0 }
 0x1ca   : > { %v496_v36 = vadd.f32 %v495_v34, %v410_v21  ;;  %v497_v37 = vpop.f32.mrb[5].mxu0 }
 0x1cb   : > { %v498_v38 = vadd.f32 %v497_v37, %v414_v22  ;;  %692 = vmatprep.mubr.f32.mxu1 %v533_v33 }
 0x1cc   : > { %693 = vmatmul.mubr.f32.gmra.mrb[2].mxu1 %v532_v35  ;;  %v534_v41 = vmax.f32 %v496_v36, 0.0 }
 0x1cd   : > { %v535_v39 = vmax.f32 %v498_v38, 0.0  ;;  %v501_v40 = vpop.f32.mrb[6].mxu0 }
 0x1ce   : > { %v502_v42 = vadd.f32 %v501_v40, %v410_v21  ;;  %v503_v43 = vpop.f32.mrb[7].mxu0 }
 0x1cf   : > { %v504_v44 = vadd.f32 %v503_v43, %v414_v22  ;;  %698 = vmatprep.mubr.f32.mxu1 %v535_v39 }
 0x1d0   : > { %699 = vmatmul.mubr.f32.gmra.mrb[4].mxu1 %v534_v41  ;;  %v536_v47 = vmax.f32 %v502_v42, 0.0 }
 0x1d1   : > { %v537_v45 = vmax.f32 %v504_v44, 0.0  ;;  %v507_v46 = vpop.f32.mrb[8].mxu0 }
 0x1d2   : > { %v508_v48 = vadd.f32 %v507_v46, %v410_v21  ;;  %v509_v49 = vpop.f32.mrb[9].mxu0 }
 0x1d3   : > { %v510_v50 = vadd.f32 %v509_v49, %v414_v22  ;;  %704 = vmatprep.mubr.f32.mxu1 %v537_v45 }
 0x1d4   : > { %705 = vmatmul.mubr.f32.gmra.mrb[6].mxu1 %v536_v47  ;;  %v538_v53 = vmax.f32 %v508_v48, 0.0 }
 0x1d5   : > { %v539_v51 = vmax.f32 %v510_v50, 0.0  ;;  %v513_v52 = vpop.f32.mrb[10].mxu0 }
 0x1d6   : > { %v514_v54 = vadd.f32 %v513_v52, %v410_v21  ;;  %v515_v55 = vpop.f32.mrb[11].mxu0 }
 0x1d7   : > { %v516_v56 = vadd.f32 %v515_v55, %v414_v22  ;;  %710 = vmatprep.mubr.f32.mxu1 %v539_v51 }
 0x1d8   : > { %711 = vmatmul.mubr.f32.gmra.mrb[8].mxu1 %v538_v53  ;;  %v540_v59 = vmax.f32 %v514_v54, 0.0 }
 0x1d9   : > { %v541_v57 = vmax.f32 %v516_v56, 0.0  ;;  %v519_v58 = vpop.f32.mrb[12].mxu0 }
 0x1da   : > { %v520_v60 = vadd.f32 %v519_v58, %v410_v21  ;;  %v521_v61 = vpop.f32.mrb[13].mxu0 }
 0x1db   : > { %v522_v62 = vadd.f32 %v521_v61, %v414_v22  ;;  %716 = vmatprep.mubr.f32.mxu1 %v541_v57 }
 0x1dc   : > { %717 = vmatmul.mubr.f32.gmra.mrb[10].mxu1 %v540_v59  ;;  %v542_v1 = vmax.f32 %v520_v60, 0.0 }
 0x1dd   : > { %v543_v63 = vmax.f32 %v522_v62, 0.0  ;;  %v525_v0 = vpop.f32.mrb[14].mxu0 }
 0x1de   : > { %v526_v2 = vadd.f32 %v525_v0, %v410_v21  ;;  %v527_v3 = vpop.f32.mrb[15].mxu0 }
 0x1df   : > { %v528_v4 = vadd.f32 %v527_v3, %v414_v22  ;;  %722 = vmatprep.mubr.f32.mxu1 %v543_v63 }
 0x1e0   : > { %723 = vmatmul.mubr.f32.gmra.mrb[12].mxu1 %v542_v1  ;;  %v544_v6 = vmax.f32 %v526_v2, 0.0 }
 0x1e1   : > { %v545_v5 = vmax.f32 %v528_v4, 0.0 }
 0x1e3   : > { %728 = vmatprep.mubr.f32.mxu1 %v545_v5 }
 0x1e4   : > { %729 = vmatmul.mubr.f32.gmra.mrb[14].mxu1 %v544_v6 }
 0x29b   : > { %v688_v10 = vpop.f32.mrb[0].mxu1 }
 0x29c   : > { %v689_v11 = vadd.f32 %v688_v10, %v615_v8  ;;  %v690_v12 = vpop.f32.mrb[1].mxu1 }
 0x29d   : > { %v691_v13 = vadd.f32 %v690_v12, %v619_v9 }
 0x29e   : > { %735 = vst [vmem:[%s1584_s9] sm:$0xff] %v689_v11 }
 0x29f   : > { %736 = vst [vmem:[%s1584_s9 + $0x8] sm:$0xff] %v691_v13  ;;  %v694_v14 = vpop.f32.mrb[2].mxu1 }
 0x2a0   : > { %v695_v15 = vadd.f32 %v694_v14, %v615_v8  ;;  %v696_v16 = vpop.f32.mrb[3].mxu1 }
 0x2a1   : > { %v697_v17 = vadd.f32 %v696_v16, %v619_v9 }
 0x2a2   : > { %737 = vst [vmem:[%s1584_s9 + $0x10] sm:$0xff] %v695_v15 }
 0x2a3   : > { %738 = vst [vmem:[%s1584_s9 + $0x18] sm:$0xff] %v697_v17  ;;  %v700_v18 = vpop.f32.mrb[4].mxu1 }
 0x2a4   : > { %v701_v19 = vadd.f32 %v700_v18, %v615_v8  ;;  %v702_v20 = vpop.f32.mrb[5].mxu1 }
 0x2a5   : > { %v703_v21 = vadd.f32 %v702_v20, %v619_v9 }
 0x2a6   : > { %739 = vst [vmem:[%s1584_s9 + $0x20] sm:$0xff] %v701_v19 }
 0x2a7   : > { %740 = vst [vmem:[%s1584_s9 + $0x28] sm:$0xff] %v703_v21  ;;  %v706_v22 = vpop.f32.mrb[6].mxu1 }
 0x2a8   : > { %v707_v23 = vadd.f32 %v706_v22, %v615_v8  ;;  %v708_v24 = vpop.f32.mrb[7].mxu1 }
 0x2a9   : > { %v709_v25 = vadd.f32 %v708_v24, %v619_v9 }
 0x2aa   : > { %741 = vst [vmem:[%s1584_s9 + $0x30] sm:$0xff] %v707_v23 }
 0x2ab   : > { %742 = vst [vmem:[%s1584_s9 + $0x38] sm:$0xff] %v709_v25  ;;  %v712_v26 = vpop.f32.mrb[8].mxu1 }
 0x2ac   : > { %v713_v27 = vadd.f32 %v712_v26, %v615_v8  ;;  %v714_v28 = vpop.f32.mrb[9].mxu1 }
 0x2ad   : > { %v715_v29 = vadd.f32 %v714_v28, %v619_v9 }
 0x2ae   : > { %743 = vst [vmem:[%s1584_s9 + $0x40] sm:$0xff] %v713_v27 }
 0x2af   : > { %744 = vst [vmem:[%s1584_s9 + $0x48] sm:$0xff] %v715_v29  ;;  %v718_v30 = vpop.f32.mrb[10].mxu1 }
 0x2b0   : > { %v719_v31 = vadd.f32 %v718_v30, %v615_v8  ;;  %v720_v32 = vpop.f32.mrb[11].mxu1 }
 0x2b1   : > { %v721_v33 = vadd.f32 %v720_v32, %v619_v9 }
 0x2b2   : > { %745 = vst [vmem:[%s1584_s9 + $0x50] sm:$0xff] %v719_v31 }
 0x2b3   : > { %746 = vst [vmem:[%s1584_s9 + $0x58] sm:$0xff] %v721_v33  ;;  %v724_v34 = vpop.f32.mrb[12].mxu1 }
 0x2b4   : > { %v725_v35 = vadd.f32 %v724_v34, %v615_v8  ;;  %v726_v36 = vpop.f32.mrb[13].mxu1 }
 0x2b5   : > { %v727_v37 = vadd.f32 %v726_v36, %v619_v9 }
 0x2b6   : > { %747 = vst [vmem:[%s1584_s9 + $0x60] sm:$0xff] %v725_v35 }
 0x2b7   : > { %748 = vst [vmem:[%s1584_s9 + $0x68] sm:$0xff] %v727_v37  ;;  %v730_v38 = vpop.f32.mrb[14].mxu1 }
 0x2b8   : > { %v731_v39 = vadd.f32 %v730_v38, %v615_v8  ;;  %v732_v40 = vpop.f32.mrb[15].mxu1 }
 0x2b9   : > { %v733_v41 = vadd.f32 %v732_v40, %v619_v9 }
 0x2ba   : > { %749 = vst [vmem:[%s1584_s9 + $0x70] sm:$0xff] %v731_v39 }
 0x2bb   : > { %750 = vst [vmem:[%s1584_s9 + $0x78] sm:$0xff] %v733_v41 }
 0x2bc   : > { %1222 = shalt.err (!%p1219_p11)
}
 0x2bd   : > { %s1223_s26 = scalar_lea.hbm %s1605_s7, 2048  ;;  %s1227_s6 = scalar_lea.hbm %s1663_s5, 4096 }
 0x2be   : > { %p1224_p0 = scmp.ne.s32.totalorder %s1605_s7, %s1223_s26  ;;  %p1228_p6 = scmp.lt.u32.totalorder %s1605_s7, %s1663_s5 }
 0x2bf   : > { %p1229_p7 = scmp.lt.u32.totalorder %s1227_s6, %s1223_s26  ;;  %p1231_p8 = scmp.lt.u32.totalorder %s1223_s26, %s1605_s7 }
 0x2c0   : > { %p1225_p4 = pnand %p1224_p0, %p1680_p12 }
 0x2c1   : > { %p1230_p2 = por %p1229_p7, %p1228_p6 }
 0x2c2   : > { %p1226_p13 = pneg %p1225_p4 }
 0x2c3   : > { %p1232_p1 = por %p1231_p8, %p1230_p2 }
 0x2c5   : > { %p1233_p10 = pnand %p1232_p1, %p1226_p13 }
 0x2c7   : > { %1236 = shalt.err (!%p1233_p10)
}
 0x2c8   : > { %s1303_s10 = smov 256   ;;  %s1304_s16 = smov 16  }
 0x2c9   : > { %1046 = dma.vmem_to_hbm [thread:$0]  (%p1680_p12), %s1607_s12, 2048, %s1605_s7, %s752_s21, %s1303_s10, %s1303_s10, %s1304_s16  }
 0x2ca PF: > { %s781_s14 = sand.u32 1, %s1275_s18   ;;  %p1681_p3 = scmp.ne.s32.totalorder %s1672_s29, 0 }
 0x2cb   : > { %p1682_p5 = scmp.ge.s32.totalorder %s1295_s23, 2  ;;  %s782_s27 = scalar_lea.sflag [#allocation4], %s781_s14 }
 0x2cd   : > { %p1060_p9 = pnand %p1682_p5, %p1681_p3 }
 0x2cf   : > { %1270 = dma.done.wait (!%p1060_p9), %s782_s27, 2048  }
 0x2d0   : > { %1272 = vsyncadd (!%p1060_p9), %s782_s27, 4294965248  ;;  %s22_s23 = sadd.s32 1, %s1295_s23   ;;  %s1683_s18 = smov %s1279_s19 }
 0x2d1   : > { %p19_p11 = scmp.ge.s32.totalorder %s22_s23, 4   ;;  %s1684_s19 = smov %s1283_s20 }
 0x2d2   : > { %s1685_s20 = smov %s1483_s17  ;;  %s1686_s21 = smov %s1291_s22 }
 0x2d3   : > { %s1687_s22 = smov %s1689_s8  ;;  %21 = sbr.rel (!%p19_p11) target bundleno = 7 (0x7), region = 98 }
 0x2da   :  { %787 = vsyncpa [#allocation3], 1 }
 0x2db   :  { %789 = vsyncpa [#allocation3 + $0x1], 1 }
 0x2dc   :  { %790 = vsyncpa [#allocation6], 1 }
 0x2dd   :  { %791 = vsyncpa [#allocation4], 1 }
 0x2de   :  { %793 = vsyncpa [#allocation4 + $0x1], 1 }

// kernel: tpu_custom_call.1
= control target key start
LH: loop header
LB: loop body
LE: loop exit
PB: predicated region body
PF: predicated region fallthrough
CT: control target
= control target key end

     0   :  { %10 = vsyncpa [#allocation3], 0  ;;  %s1658_s0 = inlined_call_operand.hbm [shape: f32[128,256], index: 0, kind: input, shape index: {}]   ;;  %s1659_s1 = inlined_call_operand.hbm [shape: f32[256,256], index: 1, kind: input, shape index: {}]   ;;  %s1660_s2 = inlined_call_operand.vmem [shape: f32[1,256], index: 2, kind: input, shape index: {}]   ;;  %s1661_s3 = inlined_call_operand.hbm [shape: f32[256,256], index: 3, kind: input, shape index: {}]   ;;  %s1662_s4 = inlined_call_operand.vmem [shape: f32[1,256], index: 4, kind: input, shape index: {}]   ;;  %s1663_s5 = inlined_call_operand.hbm [shape: f32[128,256], index: 5, kind: output, shape index: {}]  }
   0x1   :  { %12 = vsyncpa [#allocation3 + $0x1], 0 }
   0x2   :  { %13 = vsyncpa [#allocation6], 0 }
   0x3   :  { %14 = vsyncpa [#allocation4], 0 }
   0x4   :  { %16 = vsyncpa [#allocation4 + $0x1], 0  ;;  %s1335_s18 = smov 0   ;;  %s1337_s19 = smov 0  }
   0x5   :  { %s1339_s20 = smov 0   ;;  %s1341_s21 = smov 0  }
   0x6   :  { %s1343_s22 = smov 0   ;;  %s1345_s23 = smov 0  }
   0x7 LB: > { %s882_s24 = sadd.s32 4294967295, %s1295_s23   ;;  %s883_s25 = sadd.s32 4294967294, %s1295_s23   ;;  %s1295_s23 = sphi %s1345_s23, %s22_s23   ;;  %s1291_s22 = sphi %s1343_s22, %s1687_s22   ;;  %s1287_s21 = sphi %s1341_s21, %s1686_s21   ;;  %s1283_s20 = sphi %s1339_s20, %s1685_s20   ;;  %s1279_s19 = sphi %s1337_s19, %s1684_s19   ;;  %s1275_s18 = sphi %s1335_s18, %s1683_s18  }
   0x8   : > { %p54_p0 = scmp.ne.s32.totalorder %s1279_s19, %s1275_s18  ;;  %p1369_p1 = scmp.eq.s32.totalorder %s882_s24, 0 }
   0x9   : > { %p1373_p2 = scmp.eq.s32.totalorder %s882_s24, 1  ;;  %p183_p3 = scmp.eq.s32.totalorder %s883_s25, 1 }
   0xa   : > { %s1669_s26 = scalar_select %p1369_p1, 1, 0 }
   0xb   : > { %p1379_p4 = por %p1369_p1, %p54_p0  ;;  %p884_p5 = scmp.ge.s32.totalorder %s1295_s23, 1 }
   0xc   : > { %p1384_p6 = por %p183_p3, %p54_p0  ;;  %p190_p7 = scmp.lt.s32.totalorder %s1295_s23, 3 }
   0xd   : > { %s1671_s28 = scalar_select %p1379_p4, 1, 0 }
   0xe   : > { %s1672_s29 = scalar_select %p1384_p6, 1, 0 }
   0xf   : > { %p1389_p8 = pnand %p884_p5, %p190_p7  ;;  %s1297_s6 = smov [#allocation5]  }
  0x10   : > { %s206_s7 = sshll.u32 %s1297_s6, 4  ;;  %s1298_s9 = smov [#allocation7]   ;;  %s1393_s7 = int_to_ptr.vmem [resolvable:$true] %s206_s7 }
  0x11   : > { %p1048_p9 = pneg %p1389_p8  ;;  %s230_s10 = sshll.u32 %s1298_s9, 4  ;;  %s1404_s10 = int_to_ptr.vmem [resolvable:$true] %s230_s10 }
  0x12   : > { %s1123_s13 = scalar_lea.hbm %s1659_s1, 8192 }
  0x13   : > { %p1400_p11 = pnand %p1048_p9, %p1369_p1  ;;  %p1124_p12 = scmp.ne.s32.totalorder %s1659_s1, %s1123_s13 }
  0x14   : > { %p1130_p5 = scmp.lt.u32.totalorder %s1123_s13, %s1659_s1 }
  0x15   : > { %p1125_p13 = pneg %p1400_p11 }
  0x17   : > { %p1126_p0 = pnand %p1125_p13, %p1124_p12 }
  0x19   : > { %p1127_p3 = pneg %p1126_p0 }
  0x1b   : > { %p1132_p7 = pnand %p1130_p5, %p1127_p3 }
  0x1d   : > { %1135 = shalt.err (!%p1132_p7)
}
  0x1e   : > { %s1136_s24 = scalar_lea.vmem %s1393_s7, 8192  ;;  %p1144_p1 = scmp.lt.s32.totalorder %s1393_s7, %s1393_s7 }
  0x1f   : > { %p1137_p9 = scmp.ne.s32.totalorder %s1393_s7, %s1136_s24  ;;  %p1145_p12 = scmp.lt.s32.totalorder %s1136_s24, %s1136_s24 }
  0x21   : > { %p1139_p10 = pnand %p1137_p9, %p1125_p13  ;;  %p1146_p0 = por %p1145_p12, %p1144_p1 }
  0x23   : > { %p1140_p6 = pneg %p1139_p10 }
  0x25   : > { %p1147_p4 = pnand %p1146_p0, %p1140_p6 }
  0x27   : > { %1150 = shalt.err (!%p1147_p4)
}
  0x28   : > { %s1667_s25 = smov 256   ;;  %s1300_s6 = smov 16  }
  0x29   : > { %1051 = dma.hbm_to_vmem [thread:$0]  (!%p1400_p11), %s1659_s1, 8192, %s1393_s7, [#allocation6], %s1667_s25, %s1667_s25, %s1300_s6  }
  0x2a   : > { %s1151_s14 = scalar_lea.hbm %s1661_s3, 8192 }
  0x2b   : > { %p1152_p1 = scmp.ne.s32.totalorder %s1661_s3, %s1151_s14  ;;  %p1158_p10 = scmp.lt.u32.totalorder %s1151_s14, %s1661_s3 }
  0x2d   : > { %p1154_p4 = pnand %p1152_p1, %p1125_p13 }
  0x2f   : > { %p1155_p6 = pneg %p1154_p4 }
  0x31   : > { %p1160_p3 = pnand %p1158_p10, %p1155_p6 }
  0x33   : > { %1163 = shalt.err (!%p1160_p3)
}
  0x34   : > { %s1164_s7 = scalar_lea.vmem %s1404_s10, 8192  ;;  %p1172_p12 = scmp.lt.s32.totalorder %s1404_s10, %s1404_s10 }
  0x35   : > { %p1165_p5 = scmp.ne.s32.totalorder %s1404_s10, %s1164_s7  ;;  %p1173_p0 = scmp.lt.s32.totalorder %s1164_s7, %s1164_s7 }
  0x37   : > { %p1167_p7 = pnand %p1165_p5, %p1125_p13  ;;  %p1174_p1 = por %p1173_p0, %p1172_p12 }
  0x39   : > { %p1168_p9 = pneg %p1167_p7 }
  0x3b   : > { %p1175_p4 = pnand %p1174_p1, %p1168_p9 }
  0x3d   : > { %1178 = shalt.err (!%p1175_p4)
}
  0x3e   : > { %1054 = dma.hbm_to_vmem [thread:$0]  (!%p1400_p11), %s1661_s3, 8192, %s1404_s10, [#allocation6], %s1667_s25, %s1667_s25, %s1300_s6  }
  0x3f   : > { %s34_s8 = sadd.s32 1, %s1291_s22  ;;  %s41_s12 = sadd.s32 1, %s1283_s20 }
  0x40   : > { %p36_p13 = scmp.ge.s32.totalorder %s34_s8, 2  ;;  %p48_p6 = scmp.ne.s32.totalorder %s1283_s20, %s1279_s19 }
  0x41   : > { %p49_p10 = scmp.eq.s32.totalorder %s1295_s23, 0  ;;  %p1065_p3 = scmp.lt.s32.totalorder %s1295_s23, 2 }
  0x42   : > { %s1689_s8 = smov (%p36_p13, %s34_s8), 0  ;;  %p1474_p7 = por %p1373_p2, %p48_p6 }
  0x43   : > { %p50_p5 = por %p49_p10, %p48_p6  ;;  %s38_s14 = ssub.s32 %s1291_s22, %s1689_s8 }
  0x44   : > { %s1675_s13 = scalar_select %p1474_p7, 1, 0 }
  0x45   : > { %s247_s15 = sand.u32 1, %s1283_s20   ;;  %p39_p9 = scmp.eq.s32.totalorder %s38_s14, 0 }
  0x46   : > { %s889_s10 = sshll.u32 %s247_s15, 7  ;;  %s905_s16 = sshll.u32 %s1291_s22, 11 }
  0x47   : > { %s1483_s17 = scalar_select %p39_p9, %s1283_s20, %s41_s12  }
  0x48   : > { %s1488_s9 = scalar_lea.hbm %s1658_s0, %s905_s16  ;;  %s251_s27 = scalar_lea.vmem [#allocation2], %s889_s10 }
  0x49   : > { %s259_s11 = sshll.u32 %s251_s27, 4  ;;  %p1492_p2 = pnand %p1065_p3, %p50_p5  ;;  %s1496_s11 = int_to_ptr.vmem [resolvable:$true] %s259_s11 }
  0x4a   : > { %s1498_s12 = scalar_lea.sflag [#allocation3], %s247_s15  ;;  %s1179_s14 = scalar_lea.hbm %s1488_s9, 2048 }
  0x4b   : > { %p1180_p11 = scmp.ne.s32.totalorder %s1488_s9, %s1179_s14  ;;  %p1181_p12 = pneg %p1492_p2 }
  0x4c   : > { %s1184_s24 = scalar_lea.hbm %s1658_s0, 4096  ;;  %p1185_p4 = scmp.lt.u32.totalorder %s1488_s9, %s1658_s0 }
  0x4d   : > { %p1182_p0 = pnand %p1181_p12, %p1180_p11  ;;  %p1186_p13 = scmp.lt.u32.totalorder %s1184_s24, %s1179_s14 }
  0x4e   : > { %p1188_p10 = scmp.lt.u32.totalorder %s1179_s14, %s1488_s9 }
  0x4f   : > { %p1183_p1 = pneg %p1182_p0  ;;  %p1187_p6 = por %p1186_p13, %p1185_p4 }
  0x51   : > { %p1189_p3 = por %p1188_p10, %p1187_p6 }
  0x53   : > { %p1190_p5 = pnand %p1189_p3, %p1183_p1 }
  0x55   : > { %1193 = shalt.err (!%p1190_p5)
}
  0x56   : > { %s1194_s15 = scalar_lea.vmem %s1496_s11, 2048  ;;  %s1301_s10 = smov [#allocation2]  }
  0x57   : > { %p1195_p9 = scmp.ne.s32.totalorder %s1496_s11, %s1194_s15  ;;  %s1199_s16 = sshll.u32 %s1301_s10, 4  ;;  %s1200_s16 = int_to_ptr.vmem [resolvable:$false] %s1199_s16 }
  0x58   : > { %s1201_s7 = scalar_lea.vmem %s1200_s16, 4096  ;;  %p1202_p7 = scmp.lt.s32.totalorder %s1496_s11, %s1200_s16 }
  0x59   : > { %p1197_p11 = pnand %p1195_p9, %p1181_p12  ;;  %p1203_p4 = scmp.lt.s32.totalorder %s1201_s7, %s1194_s15 }
  0x5b   : > { %p1198_p0 = pneg %p1197_p11  ;;  %p1204_p13 = por %p1203_p4, %p1202_p7 }
  0x5d   : > { %p1205_p6 = pnand %p1204_p13, %p1198_p0 }
  0x5f   : > { %1208 = shalt.err (!%p1205_p6)
}
  0x60   : > { %s1677_s14 = smov 256   ;;  %271 = sbr.rel (%p1389_p8) target bundleno = 714 (0x2ca), region = 40 }
  0x61   : > { %1058 = dma.hbm_to_vmem [thread:$0]  (!%p1492_p2), %s1488_s9, 2048, %s1496_s11, %s1498_s12, %s1677_s14, %s1677_s14, %s1300_s6  }
  0x62   : > { %s1532_s24 = sand.u32 (!%p1389_p8), 1, %s1279_s19   ;;  %p1678_p7 = scmp.ne.s32.totalorder (!%p1389_p8), %s1671_s28, 0 }
  0x63   : > { %s894_s27 = sshll.u32 (!%p1389_p8), %s1532_s24, 7  ;;  %s274_s15 = scalar_lea.sflag (!%p1389_p8), [#allocation3], %s1532_s24 }
  0x64   : > { %s1538_s25 = scalar_lea.vmem (!%p1389_p8), [#allocation2], %s894_s27 }
  0x67   : > { %1262 = dma.done.wait (%p1678_p7), %s274_s15, 2048  }
  0x68   : > { %1264 = vsyncadd (%p1678_p7), %s274_s15, 4294965248  ;;  %p1679_p2 = scmp.ne.s32.totalorder %s1669_s26, 0 }
  0x6a   : > { %1266 = dma.done.wait (%p1679_p2), [#allocation6], 16384  }
  0x6b   : > { %1268 = vsyncadd (%p1679_p2), [#allocation6], 4294950912  ;;  %v342_v0 = vld [vmem:[#allocation5 + $0x8] sm:$0xff]  ;;  %v344_v1 = vld [vmem:[#allocation5 + $0x18] sm:$0xff]  ;;  %s1584_s9 = scalar_lea.vmem [#allocation8], %s894_s27  ;;  %s907_s11 = sshll.u32 %s1287_s21, 11 }
  0x6c   : > { %v341_v2 = vld [vmem:[#allocation5] sm:$0xff]  ;;  %v908_v3 = vpack.c.bf16 %v344_v1, %v342_v0  ;;  %v343_v4 = vld [vmem:[#allocation5 + $0x10] sm:$0xff]  ;;  %v346_v5 = vld [vmem:[#allocation5 + $0x28] sm:$0xff]  ;;  %s766_s12 = sshll.u32 %s1584_s9, 4  ;;  %s1605_s7 = scalar_lea.hbm %s1663_s5, %s907_s11  ;;  %s1607_s12 = int_to_ptr.vmem [resolvable:$true] %s766_s12 }
  0x6d   : > { %v348_v6 = vld [vmem:[#allocation5 + $0x38] sm:$0xff]  ;;  %v910_v7 = vpack.c.bf16 %v343_v4, %v341_v2  ;;  %v345_v9 = vld [vmem:[#allocation5 + $0x20] sm:$0xff]  ;;  %v347_v10 = vld [vmem:[#allocation5 + $0x30] sm:$0xff]  ;;  %s752_s21 = scalar_lea.sflag [#allocation4], %s1532_s24  ;;  %s1209_s14 = scalar_lea.vmem %s1607_s12, 2048 }
  0x6e   : > { %v912_v8 = vpack.c.bf16 %v348_v6, %v346_v5  ;;  %909 = vmatprep.subr.bf16.mxu0 %v908_v3  ;;  %v350_v11 = vld [vmem:[#allocation5 + $0x48] sm:$0xff]  ;;  %v352_v12 = vld [vmem:[#allocation5 + $0x58] sm:$0xff]  ;;  %v914_v13 = vpack.c.bf16 %v347_v10, %v345_v9  ;;  %v349_v15 = vld [vmem:[#allocation5 + $0x40] sm:$0xff]  ;;  %p1210_p8 = scmp.ne.s32.totalorder %s1607_s12, %s1209_s14  ;;  %p1680_p12 = scmp.ne.s32.totalorder %s1675_s13, 0 }
  0x6f   : > { %911 = vmatpush1.bf16.xpose.msra.mxu0 %v910_v7  ;;  %v916_v14 = vpack.c.bf16 %v352_v12, %v350_v11  ;;  %v351_v16 = vld [vmem:[#allocation5 + $0x50] sm:$0xff]  ;;  %v354_v17 = vld [vmem:[#allocation5 + $0x68] sm:$0xff]  ;;  %v356_v18 = vld [vmem:[#allocation5 + $0x78] sm:$0xff]  ;;  %s1302_s27 = smov [#allocation8]  }
  0x70   : > { %913 = vmatprep.subr.bf16.mxu0 %v912_v8  ;;  %v918_v19 = vpack.c.bf16 %v351_v16, %v349_v15  ;;  %v920_v20 = vpack.c.bf16 %v356_v18, %v354_v17  ;;  %v353_v21 = vld [vmem:[#allocation5 + $0x60] sm:$0xff]  ;;  %v355_v22 = vld [vmem:[#allocation5 + $0x70] sm:$0xff]  ;;  %v326_v23 = vld [vmem:[%s1538_s25 + $0x8] sm:$0xff]  ;;  %p1211_p1 = pnand %p1210_p8, %p1680_p12  ;;  %s1213_s15 = sshll.u32 %s1302_s27, 4  ;;  %s1214_s15 = int_to_ptr.vmem [resolvable:$false] %s1213_s15 }
  0x71   : > { %v358_v24 = vld [vmem:[#allocation5 + $0x88] sm:$0xff]  ;;  %v360_v25 = vld [vmem:[#allocation5 + $0x98] sm:$0xff]  ;;  %481 = vmatprep.mubr.f32.mxu0 %v326_v23  ;;  %v922_v26 = vpack.c.bf16 %v355_v22, %v353_v21  ;;  %v357_v28 = vld [vmem:[#allocation5 + $0x80] sm:$0xff]  ;;  %p1216_p3 = scmp.lt.s32.totalorder %s1607_s12, %s1214_s15 }
  0x72   : > { %v924_v27 = vpack.c.bf16 %v360_v25, %v358_v24  ;;  %v359_v29 = vld [vmem:[#allocation5 + $0x90] sm:$0xff]  ;;  %v362_v30 = vld [vmem:[#allocation5 + $0xa8] sm:$0xff]  ;;  %v364_v31 = vld [vmem:[#allocation5 + $0xb8] sm:$0xff]  ;;  %p1212_p10 = pneg %p1211_p1 }
  0x73   : > { %v547_v32 = vld [vmem:[#allocation7 + $0x8] sm:$0xff]  ;;  %v549_v33 = vld [vmem:[#allocation7 + $0x18] sm:$0xff]  ;;  %v546_v34 = vld [vmem:[#allocation7] sm:$0xff]  ;;  %v926_v35 = vpack.c.bf16 %v359_v29, %v357_v28  ;;  %v928_v40 = vpack.c.bf16 %v364_v31, %v362_v30 }
  0x74   : > { %v972_v36 = vpack.c.bf16 %v549_v33, %v547_v32  ;;  %v548_v37 = vld [vmem:[#allocation7 + $0x10] sm:$0xff]  ;;  %v551_v38 = vld [vmem:[#allocation7 + $0x28] sm:$0xff]  ;;  %v553_v39 = vld [vmem:[#allocation7 + $0x38] sm:$0xff] }
  0x75   : > { %v974_v41 = vpack.c.bf16 %v548_v37, %v546_v34  ;;  %v976_v42 = vpack.c.bf16 %v553_v39, %v551_v38  ;;  %v361_v43 = vld [vmem:[#allocation5 + $0xa0] sm:$0xff]  ;;  %v552_v45 = vld [vmem:[#allocation7 + $0x30] sm:$0xff]  ;;  %v555_v47 = vld [vmem:[#allocation7 + $0x48] sm:$0xff] }
  0x76   : > { %973 = vmatprep.subr.bf16.mxu1 %v972_v36  ;;  %v550_v44 = vld [vmem:[#allocation7 + $0x20] sm:$0xff]  ;;  %v363_v46 = vld [vmem:[#allocation5 + $0xb0] sm:$0xff]  ;;  %v557_v48 = vld [vmem:[#allocation7 + $0x58] sm:$0xff] }
  0x77   : > { %915 = vmatpush1.bf16.xpose.msra.mxu0 %v914_v13  ;;  %975 = vmatpush1.bf16.xpose.msra.mxu1 %v974_v41  ;;  %v366_v49 = vld [vmem:[#allocation5 + $0xc8] sm:$0xff]  ;;  %v368_v50 = vld [vmem:[#allocation5 + $0xd8] sm:$0xff]  ;;  %v978_v51 = vpack.c.bf16 %v552_v45, %v550_v44  ;;  %v930_v52 = vpack.c.bf16 %v363_v46, %v361_v43  ;;  %v980_v53 = vpack.c.bf16 %v557_v48, %v555_v47  ;;  %v365_v55 = vld [vmem:[#allocation5 + $0xc0] sm:$0xff] }
  0x78   : > { %917 = vmatprep.subr.bf16.mxu0 %v916_v14  ;;  %977 = vmatprep.subr.bf16.mxu1 %v976_v42  ;;  %v932_v54 = vpack.c.bf16 %v368_v50, %v366_v49  ;;  %v554_v56 = vld [vmem:[#allocation7 + $0x40] sm:$0xff]  ;;  %v556_v57 = vld [vmem:[#allocation7 + $0x50] sm:$0xff]  ;;  %v559_v59 = vld [vmem:[#allocation7 + $0x68] sm:$0xff] }
  0x79   : > { %v367_v58 = vld [vmem:[#allocation5 + $0xd0] sm:$0xff]  ;;  %v561_v60 = vld [vmem:[#allocation7 + $0x78] sm:$0xff]  ;;  %v370_v61 = vld [vmem:[#allocation5 + $0xe8] sm:$0xff]  ;;  %v982_v63 = vpack.c.bf16 %v556_v57, %v554_v56 }
  0x7a   : > { %v372_v62 = vld [vmem:[#allocation5 + $0xf8] sm:$0xff]  ;;  %v934_v0 = vpack.c.bf16 %v367_v58, %v365_v55  ;;  %v984_v1 = vpack.c.bf16 %v561_v60, %v559_v59  ;;  %v369_v3 = vld [vmem:[#allocation5 + $0xe0] sm:$0xff]  ;;  %v560_v5 = vld [vmem:[#allocation7 + $0x70] sm:$0xff] }
  0x7b   : > { %v936_v2 = vpack.c.bf16 %v372_v62, %v370_v61  ;;  %v558_v4 = vld [vmem:[#allocation7 + $0x60] sm:$0xff]  ;;  %v371_v6 = vld [vmem:[#allocation5 + $0xf0] sm:$0xff]  ;;  %v563_v7 = vld [vmem:[#allocation7 + $0x88] sm:$0xff] }
  0x7c   : > { %v565_v8 = vld [vmem:[#allocation7 + $0x98] sm:$0xff]  ;;  %v374_v9 = vld [vmem:[#allocation5 + $0x108] sm:$0xff]  ;;  %v986_v11 = vpack.c.bf16 %v560_v5, %v558_v4  ;;  %v938_v12 = vpack.c.bf16 %v371_v6, %v369_v3  ;;  %v373_v15 = vld [vmem:[#allocation5 + $0x100] sm:$0xff] }
  0x7d   : > { %v376_v10 = vld [vmem:[#allocation5 + $0x118] sm:$0xff]  ;;  %v988_v13 = vpack.c.bf16 %v565_v8, %v563_v7  ;;  %v562_v16 = vld [vmem:[#allocation7 + $0x80] sm:$0xff]  ;;  %v564_v17 = vld [vmem:[#allocation7 + $0x90] sm:$0xff] }
  0x7e   : > { %v940_v14 = vpack.c.bf16 %v376_v10, %v374_v9  ;;  %v375_v18 = vld [vmem:[#allocation5 + $0x110] sm:$0xff]  ;;  %v378_v21 = vld [vmem:[#allocation5 + $0x128] sm:$0xff]  ;;  %v380_v22 = vld [vmem:[#allocation5 + $0x138] sm:$0xff]  ;;  %v990_v23 = vpack.c.bf16 %v564_v17, %v562_v16 }
  0x7f   : > { %919 = vmatpush1.bf16.xpose.msra.mxu0 %v918_v19  ;;  %979 = vmatpush1.bf16.xpose.msra.mxu1 %v978_v51  ;;  %v567_v19 = vld [vmem:[#allocation7 + $0xa8] sm:$0xff]  ;;  %v942_v24 = vpack.c.bf16 %v375_v18, %v373_v15  ;;  %v566_v28 = vld [vmem:[#allocation7 + $0xa0] sm:$0xff]  ;;  %v568_v29 = vld [vmem:[#allocation7 + $0xb0] sm:$0xff] }
  0x80   : > { %921 = vmatprep.subr.bf16.mxu0 %v920_v20  ;;  %981 = vmatprep.subr.bf16.mxu1 %v980_v53  ;;  %v569_v20 = vld [vmem:[#allocation7 + $0xb8] sm:$0xff]  ;;  %v379_v30 = vld [vmem:[#allocation5 + $0x130] sm:$0xff]  ;;  %v571_v31 = vld [vmem:[#allocation7 + $0xc8] sm:$0xff] }
  0x81   : > { %v992_v25 = vpack.c.bf16 %v569_v20, %v567_v19  ;;  %v573_v32 = vld [vmem:[#allocation7 + $0xd8] sm:$0xff]  ;;  %v382_v33 = vld [vmem:[#allocation5 + $0x148] sm:$0xff]  ;;  %v381_v39 = vld [vmem:[#allocation5 + $0x140] sm:$0xff] }
  0x82   : > { %v384_v34 = vld [vmem:[#allocation5 + $0x158] sm:$0xff]  ;;  %v996_v37 = vpack.c.bf16 %v573_v32, %v571_v31  ;;  %v572_v41 = vld [vmem:[#allocation7 + $0xd0] sm:$0xff]  ;;  %v575_v43 = vld [vmem:[#allocation7 + $0xe8] sm:$0xff] }
  0x83   : > { %v948_v38 = vpack.c.bf16 %v384_v34, %v382_v33  ;;  %v383_v42 = vld [vmem:[#allocation5 + $0x150] sm:$0xff]  ;;  %v577_v44 = vld [vmem:[#allocation7 + $0xf8] sm:$0xff]  ;;  %v386_v45 = vld [vmem:[#allocation5 + $0x168] sm:$0xff] }
  0x84   : > { %v388_v46 = vld [vmem:[#allocation5 + $0x178] sm:$0xff]  ;;  %v950_v48 = vpack.c.bf16 %v383_v42, %v381_v39  ;;  %v1000_v49 = vpack.c.bf16 %v577_v44, %v575_v43  ;;  %v385_v51 = vld [vmem:[#allocation5 + $0x160] sm:$0xff]  ;;  %v576_v53 = vld [vmem:[#allocation7 + $0xf0] sm:$0xff] }
  0x85   : > { %v952_v50 = vpack.c.bf16 %v388_v46, %v386_v45  ;;  %v579_v55 = vld [vmem:[#allocation7 + $0x108] sm:$0xff]  ;;  %v581_v56 = vld [vmem:[#allocation7 + $0x118] sm:$0xff]  ;;  %v594_v44 = vld [vmem:[#allocation7 + $0x180] sm:$0xff] }
  0x86   : > { %v390_v57 = vld [vmem:[#allocation5 + $0x188] sm:$0xff]  ;;  %v392_v58 = vld [vmem:[#allocation5 + $0x198] sm:$0xff]  ;;  %v1004_v61 = vpack.c.bf16 %v581_v56, %v579_v55  ;;  %v596_v45 = vld [vmem:[#allocation7 + $0x190] sm:$0xff] }
  0x87   : > { %923 = vmatpush1.bf16.xpose.msra.mxu0 %v922_v26  ;;  %983 = vmatpush1.bf16.xpose.msra.mxu1 %v982_v63  ;;  %v944_v26 = vpack.c.bf16 %v380_v22, %v378_v21  ;;  %v956_v62 = vpack.c.bf16 %v392_v58, %v390_v57  ;;  %v389_v63 = vld [vmem:[#allocation5 + $0x180] sm:$0xff]  ;;  %v583_v3 = vld [vmem:[#allocation7 + $0x128] sm:$0xff]  ;;  %v585_v4 = vld [vmem:[#allocation7 + $0x138] sm:$0xff] }
  0x88   : > { %925 = vmatprep.subr.bf16.mxu0 %v924_v27  ;;  %985 = vmatprep.subr.bf16.mxu1 %v984_v1  ;;  %v377_v27 = vld [vmem:[#allocation5 + $0x120] sm:$0xff]  ;;  %v580_v1 = vld [vmem:[#allocation7 + $0x110] sm:$0xff]  ;;  %v394_v5 = vld [vmem:[#allocation5 + $0x1a8] sm:$0xff]  ;;  %v1008_v9 = vpack.c.bf16 %v585_v4, %v583_v3 }
  0x89   : > { %v946_v36 = vpack.c.bf16 %v379_v30, %v377_v27  ;;  %v396_v6 = vld [vmem:[#allocation5 + $0x1b8] sm:$0xff]  ;;  %v587_v15 = vld [vmem:[#allocation7 + $0x148] sm:$0xff] }
  0x8a   : > { %v960_v10 = vpack.c.bf16 %v396_v6, %v394_v5  ;;  %v589_v16 = vld [vmem:[#allocation7 + $0x158] sm:$0xff]  ;;  %v398_v17 = vld [vmem:[#allocation5 + $0x1c8] sm:$0xff]  ;;  %v333_v5 = vld [vmem:[%s1538_s25 + $0x40] sm:$0xff] }
  0x8b   : > { %v400_v18 = vld [vmem:[#allocation5 + $0x1d8] sm:$0xff]  ;;  %v1012_v21 = vpack.c.bf16 %v589_v16, %v587_v15  ;;  %v591_v27 = vld [vmem:[#allocation7 + $0x168] sm:$0xff]  ;;  %v407_v16 = vlaneseq }
  0x8c   : > { %v964_v22 = vpack.c.bf16 %v400_v18, %v398_v17  ;;  %v404_v30 = vld [vmem:[#allocation5 + $0x1f8] sm:$0xff]  ;;  %v595_v39 = vld [vmem:[#allocation7 + $0x188] sm:$0xff] }
  0x8d   : > { %v599_v46 = vld [vmem:[#allocation7 + $0x1a8] sm:$0xff]  ;;  %v605_v57 = vld [vmem:[#allocation7 + $0x1d8] sm:$0xff]  ;;  %v1564_v17 = vshrl.u32 %v407_v16, 7 }
  0x8e   : > { %v330_v55 = vld [vmem:[%s1538_s25 + $0x28] sm:$0xff]  ;;  %v609_v3 = vld [vmem:[#allocation7 + $0x1f8] sm:$0xff] }
  0x8f   : > { %927 = vmatpush1.bf16.xpose.msra.mxu0 %v926_v35  ;;  %987 = vmatpush1.bf16.xpose.msra.mxu1 %v986_v11  ;;  %v994_v35 = vpack.c.bf16 %v568_v29, %v566_v28  ;;  %v393_v11 = vld [vmem:[#allocation5 + $0x1a0] sm:$0xff]  ;;  %v593_v28 = vld [vmem:[#allocation7 + $0x178] sm:$0xff]  ;;  %v402_v29 = vld [vmem:[#allocation5 + $0x1e8] sm:$0xff]  ;;  %v409_v18 = vsub.s32 0, %v1564_v17 }
  0x90   : > { %929 = vmatprep.subr.bf16.mxu0 %v928_v40  ;;  %989 = vmatprep.subr.bf16.mxu1 %v988_v13  ;;  %v570_v40 = vld [vmem:[#allocation7 + $0xc0] sm:$0xff]  ;;  %v584_v13 = vld [vmem:[#allocation7 + $0x130] sm:$0xff]  ;;  %v1016_v33 = vpack.c.bf16 %v593_v28, %v591_v27  ;;  %v968_v34 = vpack.c.bf16 %v404_v30, %v402_v29  ;;  %v603_v56 = vld [vmem:[#allocation7 + $0x1c8] sm:$0xff] }
  0x91   : > { %v998_v47 = vpack.c.bf16 %v572_v41, %v570_v40  ;;  %v597_v40 = vld [vmem:[#allocation7 + $0x198] sm:$0xff] }
  0x92   : > { %v1020_v43 = vpack.c.bf16 %v597_v40, %v595_v39 }
  0x97   : > { %931 = vmatpush1.bf16.xpose.msra.mxu0 %v930_v52  ;;  %991 = vmatpush1.bf16.xpose.msra.mxu1 %v990_v23  ;;  %v574_v52 = vld [vmem:[#allocation7 + $0xe0] sm:$0xff] }
  0x98   : > { %933 = vmatprep.subr.bf16.mxu0 %v932_v54  ;;  %993 = vmatprep.subr.bf16.mxu1 %v992_v25  ;;  %v387_v54 = vld [vmem:[#allocation5 + $0x170] sm:$0xff]  ;;  %v1002_v59 = vpack.c.bf16 %v576_v53, %v574_v52  ;;  %v397_v23 = vld [vmem:[#allocation5 + $0x1c0] sm:$0xff] }
  0x99   : > { %v954_v60 = vpack.c.bf16 %v387_v54, %v385_v51  ;;  %v588_v25 = vld [vmem:[#allocation7 + $0x150] sm:$0xff]  ;;  %v328_v51 = vld [vmem:[%s1538_s25 + $0x18] sm:$0xff]  ;;  %v598_v53 = vld [vmem:[#allocation7 + $0x1a0] sm:$0xff] }
  0x9a   : > { %v327_v52 = vld [vmem:[%s1538_s25 + $0x10] sm:$0xff] }
  0x9b   : > { %v600_v54 = vld [vmem:[#allocation7 + $0x1b0] sm:$0xff] }
  0x9c   : > { %v1026_v58 = vpack.c.bf16 %v600_v54, %v598_v53 }
  0x9f   : > { %935 = vmatpush1.bf16.xpose.msra.mxu0 %v934_v0  ;;  %995 = vmatpush1.bf16.xpose.msra.mxu1 %v994_v35  ;;  %v578_v0 = vld [vmem:[#allocation7 + $0x100] sm:$0xff] }
  0xa0   : > { %937 = vmatprep.subr.bf16.mxu0 %v936_v2  ;;  %997 = vmatprep.subr.bf16.mxu1 %v996_v37  ;;  %v391_v2 = vld [vmem:[#allocation5 + $0x190] sm:$0xff]  ;;  %v1006_v7 = vpack.c.bf16 %v580_v1, %v578_v0  ;;  %v401_v35 = vld [vmem:[#allocation5 + $0x1e0] sm:$0xff]  ;;  %v334_v1 = vld [vmem:[%s1538_s25 + $0x48] sm:$0xff] }
  0xa1   : > { %v958_v8 = vpack.c.bf16 %v391_v2, %v389_v63  ;;  %v592_v37 = vld [vmem:[#allocation7 + $0x170] sm:$0xff]  ;;  %v602_v63 = vld [vmem:[#allocation7 + $0x1c0] sm:$0xff]  ;;  %v607_v2 = vld [vmem:[#allocation7 + $0x1e8] sm:$0xff] }
  0xa2   : > { %v604_v0 = vld [vmem:[#allocation7 + $0x1d0] sm:$0xff]  ;;  %v1032_v6 = vpack.c.bf16 %v609_v3, %v607_v2 }
  0xa3   : > { %v1030_v4 = vpack.c.bf16 %v604_v0, %v602_v63 }
  0xa7   : > { %939 = vmatpush1.bf16.xpose.msra.mxu0 %v938_v12  ;;  %999 = vmatpush1.bf16.xpose.msra.mxu1 %v998_v47  ;;  %v582_v12 = vld [vmem:[#allocation7 + $0x120] sm:$0xff]  ;;  %v601_v47 = vld [vmem:[#allocation7 + $0x1b8] sm:$0xff] }
  0xa8   : > { %941 = vmatprep.subr.bf16.mxu0 %v940_v14  ;;  %1001 = vmatprep.subr.bf16.mxu1 %v1000_v49  ;;  %v395_v14 = vld [vmem:[#allocation5 + $0x1b0] sm:$0xff]  ;;  %v1010_v19 = vpack.c.bf16 %v584_v13, %v582_v12  ;;  %v325_v49 = vld [vmem:[%s1538_s25] sm:$0xff] }
  0xa9   : > { %v962_v20 = vpack.c.bf16 %v395_v14, %v393_v11  ;;  %v340_v11 = vld [vmem:[%s1538_s25 + $0x78] sm:$0xff]  ;;  %v339_v12 = vld [vmem:[%s1538_s25 + $0x70] sm:$0xff]  ;;  %v606_v13 = vld [vmem:[#allocation7 + $0x1e0] sm:$0xff] }
  0xaa   : > { %v608_v14 = vld [vmem:[#allocation7 + $0x1f0] sm:$0xff] }
  0xab   : > { %v1034_v15 = vpack.c.bf16 %v608_v14, %v606_v13 }
  0xaf   : > { %943 = vmatpush1.bf16.xpose.msra.mxu0 %v942_v24  ;;  %1003 = vmatpush1.bf16.xpose.msra.mxu1 %v1002_v59  ;;  %v586_v24 = vld [vmem:[#allocation7 + $0x140] sm:$0xff] }
  0xb0   : > { %945 = vmatprep.subr.bf16.mxu0 %v944_v26  ;;  %1005 = vmatprep.subr.bf16.mxu1 %v1004_v61  ;;  %v399_v26 = vld [vmem:[#allocation5 + $0x1d0] sm:$0xff]  ;;  %v1014_v31 = vpack.c.bf16 %v588_v25, %v586_v24  ;;  %v329_v59 = vld [vmem:[%s1538_s25 + $0x20] sm:$0xff]  ;;  %v332_v61 = vld [vmem:[%s1538_s25 + $0x38] sm:$0xff] }
  0xb1   : > { %v966_v32 = vpack.c.bf16 %v399_v26, %v397_v23 }
  0xb7   : > { %947 = vmatpush1.bf16.xpose.msra.mxu0 %v946_v36  ;;  %1007 = vmatpush1.bf16.xpose.msra.mxu1 %v1006_v7  ;;  %v590_v36 = vld [vmem:[#allocation7 + $0x160] sm:$0xff]  ;;  %v336_v7 = vld [vmem:[%s1538_s25 + $0x58] sm:$0xff] }
  0xb8   : > { %949 = vmatprep.subr.bf16.mxu0 %v948_v38  ;;  %1009 = vmatprep.subr.bf16.mxu1 %v1008_v9  ;;  %v403_v38 = vld [vmem:[#allocation5 + $0x1f0] sm:$0xff]  ;;  %v1018_v41 = vpack.c.bf16 %v592_v37, %v590_v36  ;;  %v338_v9 = vld [vmem:[%s1538_s25 + $0x68] sm:$0xff] }
  0xb9   : > { %v970_v42 = vpack.c.bf16 %v403_v38, %v401_v35 }
  0xbf   : > { %951 = vmatpush1.bf16.xpose.msra.mxu0 %v950_v48  ;;  %1011 = vmatpush1.bf16.xpose.msra.mxu1 %v1010_v19  ;;  %v1022_v48 = vpack.c.bf16 %v596_v45, %v594_v44  ;;  %v405_v19 = vld [vmem:[%s1660_s2] sm:$0x3] }
  0xc0   : > { %953 = vmatprep.subr.bf16.mxu0 %v952_v50  ;;  %1013 = vmatprep.subr.bf16.mxu1 %v1012_v21  ;;  %v1024_v50 = vpack.c.bf16 %v601_v47, %v599_v46  ;;  %v410_v21 = vrot.slane %v405_v19, %v409_v18 }
  0xc7   : > { %955 = vmatpush1.bf16.xpose.msra.mxu0 %v954_v60  ;;  %1015 = vmatpush1.bf16.xpose.msra.mxu1 %v1014_v31  ;;  %v1028_v60 = vpack.c.bf16 %v605_v57, %v603_v56 }
  0xc8   : > { %957 = vmatprep.subr.bf16.mxu0 %v956_v62  ;;  %1017 = vmatprep.subr.bf16.mxu1 %v1016_v33  ;;  %v331_v62 = vld [vmem:[%s1538_s25 + $0x30] sm:$0xff] }
  0xcf   : > { %959 = vmatpush1.bf16.xpose.msra.mxu0 %v958_v8  ;;  %1019 = vmatpush1.bf16.xpose.msra.mxu1 %v1018_v41  ;;  %v335_v8 = vld [vmem:[%s1538_s25 + $0x50] sm:$0xff] }
  0xd0   : > { %961 = vmatprep.subr.bf16.mxu0 %v960_v10  ;;  %1021 = vmatprep.subr.bf16.mxu1 %v1020_v43  ;;  %v337_v10 = vld [vmem:[%s1538_s25 + $0x60] sm:$0xff]  ;;  %s1215_s25 = scalar_lea.vmem %s1214_s15, 4096 }
  0xd1   : > { %p1217_p5 = scmp.lt.s32.totalorder %s1215_s25, %s1209_s14 }
  0xd3   : > { %p1218_p9 = por %p1217_p5, %p1216_p3 }
  0xd5   : > { %p1219_p11 = pnand %p1218_p9, %p1212_p10 }
  0xd7   : > { %963 = vmatpush1.bf16.xpose.msra.mxu0 %v962_v20  ;;  %1023 = vmatpush1.bf16.xpose.msra.mxu1 %v1022_v48  ;;  %v413_v20 = vsub.s32 1, %v1564_v17 }
  0xd8   : > { %965 = vmatprep.subr.bf16.mxu0 %v964_v22  ;;  %1025 = vmatprep.subr.bf16.mxu1 %v1024_v50 }
  0xd9   : > { %v414_v22 = vrot.slane %v405_v19, %v413_v20 }
  0xdf   : > { %967 = vmatpush1.bf16.xpose.msra.mxu0 %v966_v32  ;;  %1027 = vmatpush1.bf16.xpose.msra.mxu1 %v1026_v58 }
  0xe0   : > { %969 = vmatprep.subr.bf16.mxu0 %v968_v34  ;;  %1029 = vmatprep.subr.bf16.mxu1 %v1028_v60 }
  0xe7   : > { %971 = vmatpush1.bf16.xpose.msra.mxu0 %v970_v42  ;;  %1031 = vmatpush1.bf16.xpose.msra.mxu1 %v1030_v4 }
  0xe8   : > { %1033 = vmatprep.subr.bf16.mxu1 %v1032_v6 }
  0xee   : > { %482 = vmatmul.mubr.f32.vlgmr.msra.gmra.mrb[0].mxu0 %v325_v49 }
  0xef   : > { %487 = vmatprep.mubr.f32.mxu0 %v328_v51  ;;  %1035 = vmatpush1.bf16.xpose.msra.mxu1 %v1034_v15 }
  0xf2   : > { %488 = vmatmul.mubr.f32.gmra.mrb[2].mxu0 %v327_v52 }
  0xf3   : > { %493 = vmatprep.mubr.f32.mxu0 %v330_v55 }
  0xf6   : > { %494 = vmatmul.mubr.f32.gmra.mrb[4].mxu0 %v329_v59 }
  0xf7   : > { %499 = vmatprep.mubr.f32.mxu0 %v332_v61 }
  0xfa   : > { %500 = vmatmul.mubr.f32.gmra.mrb[6].mxu0 %v331_v62 }
  0xfb   : > { %505 = vmatprep.mubr.f32.mxu0 %v334_v1 }
  0xfe   : > { %506 = vmatmul.mubr.f32.gmra.mrb[8].mxu0 %v333_v5 }
  0xff   : > { %511 = vmatprep.mubr.f32.mxu0 %v336_v7  ;;  %v610_v7 = vld [vmem:[%s1662_s4] sm:$0x3] }
 0x102   : > { %512 = vmatmul.mubr.f32.gmra.mrb[10].mxu0 %v335_v8  ;;  %v615_v8 = vrot.slane %v610_v7, %v409_v18 }
 0x103   : > { %517 = vmatprep.mubr.f32.mxu0 %v338_v9  ;;  %v619_v9 = vrot.slane %v610_v7, %v413_v20 }
 0x106   : > { %518 = vmatmul.mubr.f32.gmra.mrb[12].mxu0 %v337_v10 }
 0x107   : > { %523 = vmatprep.mubr.f32.mxu0 %v340_v11 }
 0x10a   : > { %524 = vmatmul.mubr.f32.gmra.mrb[14].mxu0 %v339_v12 }
 0x1c1   : > { %v483_v23 = vpop.f32.mrb[0].mxu0 }
 0x1c2   : > { %v484_v24 = vadd.f32 %v483_v23, %v410_v21  ;;  %v485_v25 = vpop.f32.mrb[1].mxu0 }
 0x1c3   : > { %v486_v26 = vadd.f32 %v485_v25, %v414_v22 }
 0x1c4   : > { %v530_v29 = vmax.f32 %v484_v24, 0.0 }
 0x1c5   : > { %v489_v27 = vpop.f32.mrb[2].mxu0  ;;  %v531_v28 = vmax.f32 %v486_v26, 0.0 }
 0x1c6   : > { %v490_v30 = vadd.f32 %v489_v27, %v410_v21  ;;  %v491_v31 = vpop.f32.mrb[3].mxu0 }
 0x1c7   : > { %v492_v32 = vadd.f32 %v491_v31, %v414_v22  ;;  %686 = vmatprep.mubr.f32.mxu1 %v531_v28 }
 0x1c8   : > { %687 = vmatmul.mubr.f32.vlgmr.msra.gmra.mrb[0].mxu1 %v530_v29  ;;  %v532_v35 = vmax.f32 %v490_v30, 0.0 }
 0x1c9   : > { %v533_v33 = vmax.f32 %v492_v32, 0.0  ;;  %v495_v34 = vpop.f32.mrb[4].mxu0 }
 0x1ca   : > { %v496_v36 = vadd.f32 %v495_v34, %v410_v21  ;;  %v497_v37 = vpop.f32.mrb[5].mxu0 }
 0x1cb   : > { %v498_v38 = vadd.f32 %v497_v37, %v414_v22  ;;  %692 = vmatprep.mubr.f32.mxu1 %v533_v33 }
 0x1cc   : > { %693 = vmatmul.mubr.f32.gmra.mrb[2].mxu1 %v532_v35  ;;  %v534_v41 = vmax.f32 %v496_v36, 0.0 }
 0x1cd   : > { %v535_v39 = vmax.f32 %v498_v38, 0.0  ;;  %v501_v40 = vpop.f32.mrb[6].mxu0 }
 0x1ce   : > { %v502_v42 = vadd.f32 %v501_v40, %v410_v21  ;;  %v503_v43 = vpop.f32.mrb[7].mxu0 }
 0x1cf   : > { %v504_v44 = vadd.f32 %v503_v43, %v414_v22  ;;  %698 = vmatprep.mubr.f32.mxu1 %v535_v39 }
 0x1d0   : > { %699 = vmatmul.mubr.f32.gmra.mrb[4].mxu1 %v534_v41  ;;  %v536_v47 = vmax.f32 %v502_v42, 0.0 }
 0x1d1   : > { %v537_v45 = vmax.f32 %v504_v44, 0.0  ;;  %v507_v46 = vpop.f32.mrb[8].mxu0 }
 0x1d2   : > { %v508_v48 = vadd.f32 %v507_v46, %v410_v21  ;;  %v509_v49 = vpop.f32.mrb[9].mxu0 }
 0x1d3   : > { %v510_v50 = vadd.f32 %v509_v49, %v414_v22  ;;  %704 = vmatprep.mubr.f32.mxu1 %v537_v45 }
 0x1d4   : > { %705 = vmatmul.mubr.f32.gmra.mrb[6].mxu1 %v536_v47  ;;  %v538_v53 = vmax.f32 %v508_v48, 0.0 }
 0x1d5   : > { %v539_v51 = vmax.f32 %v510_v50, 0.0  ;;  %v513_v52 = vpop.f32.mrb[10].mxu0 }
 0x1d6   : > { %v514_v54 = vadd.f32 %v513_v52, %v410_v21  ;;  %v515_v55 = vpop.f32.mrb[11].mxu0 }
 0x1d7   : > { %v516_v56 = vadd.f32 %v515_v55, %v414_v22  ;;  %710 = vmatprep.mubr.f32.mxu1 %v539_v51 }
 0x1d8   : > { %711 = vmatmul.mubr.f32.gmra.mrb[8].mxu1 %v538_v53  ;;  %v540_v59 = vmax.f32 %v514_v54, 0.0 }
 0x1d9   : > { %v541_v57 = vmax.f32 %v516_v56, 0.0  ;;  %v519_v58 = vpop.f32.mrb[12].mxu0 }
 0x1da   : > { %v520_v60 = vadd.f32 %v519_v58, %v410_v21  ;;  %v521_v61 = vpop.f32.mrb[13].mxu0 }
 0x1db   : > { %v522_v62 = vadd.f32 %v521_v61, %v414_v22  ;;  %716 = vmatprep.mubr.f32.mxu1 %v541_v57 }
 0x1dc   : > { %717 = vmatmul.mubr.f32.gmra.mrb[10].mxu1 %v540_v59  ;;  %v542_v1 = vmax.f32 %v520_v60, 0.0 }
 0x1dd   : > { %v543_v63 = vmax.f32 %v522_v62, 0.0  ;;  %v525_v0 = vpop.f32.mrb[14].mxu0 }
 0x1de   : > { %v526_v2 = vadd.f32 %v525_v0, %v410_v21  ;;  %v527_v3 = vpop.f32.mrb[15].mxu0 }
 0x1df   : > { %v528_v4 = vadd.f32 %v527_v3, %v414_v22  ;;  %722 = vmatprep.mubr.f32.mxu1 %v543_v63 }
 0x1e0   : > { %723 = vmatmul.mubr.f32.gmra.mrb[12].mxu1 %v542_v1  ;;  %v544_v6 = vmax.f32 %v526_v2, 0.0 }
 0x1e1   : > { %v545_v5 = vmax.f32 %v528_v4, 0.0 }
 0x1e3   : > { %728 = vmatprep.mubr.f32.mxu1 %v545_v5 }
 0x1e4   : > { %729 = vmatmul.mubr.f32.gmra.mrb[14].mxu1 %v544_v6 }
 0x29b   : > { %v688_v10 = vpop.f32.mrb[0].mxu1 }
 0x29c   : > { %v689_v11 = vadd.f32 %v688_v10, %v615_v8  ;;  %v690_v12 = vpop.f32.mrb[1].mxu1 }
 0x29d   : > { %v691_v13 = vadd.f32 %v690_v12, %v619_v9 }
 0x29e   : > { %735 = vst [vmem:[%s1584_s9] sm:$0xff] %v689_v11 }
 0x29f   : > { %736 = vst [vmem:[%s1584_s9 + $0x8] sm:$0xff] %v691_v13  ;;  %v694_v14 = vpop.f32.mrb[2].mxu1 }
 0x2a0   : > { %v695_v15 = vadd.f32 %v694_v14, %v615_v8  ;;  %v696_v16 = vpop.f32.mrb[3].mxu1 }
 0x2a1   : > { %v697_v17 = vadd.f32 %v696_v16, %v619_v9 }
 0x2a2   : > { %737 = vst [vmem:[%s1584_s9 + $0x10] sm:$0xff] %v695_v15 }
 0x2a3   : > { %738 = vst [vmem:[%s1584_s9 + $0x18] sm:$0xff] %v697_v17  ;;  %v700_v18 = vpop.f32.mrb[4].mxu1 }
 0x2a4   : > { %v701_v19 = vadd.f32 %v700_v18, %v615_v8  ;;  %v702_v20 = vpop.f32.mrb[5].mxu1 }
 0x2a5   : > { %v703_v21 = vadd.f32 %v702_v20, %v619_v9 }
 0x2a6   : > { %739 = vst [vmem:[%s1584_s9 + $0x20] sm:$0xff] %v701_v19 }
 0x2a7   : > { %740 = vst [vmem:[%s1584_s9 + $0x28] sm:$0xff] %v703_v21  ;;  %v706_v22 = vpop.f32.mrb[6].mxu1 }
 0x2a8   : > { %v707_v23 = vadd.f32 %v706_v22, %v615_v8  ;;  %v708_v24 = vpop.f32.mrb[7].mxu1 }
 0x2a9   : > { %v709_v25 = vadd.f32 %v708_v24, %v619_v9 }
 0x2aa   : > { %741 = vst [vmem:[%s1584_s9 + $0x30] sm:$0xff] %v707_v23 }
 0x2ab   : > { %742 = vst [vmem:[%s1584_s9 + $0x38] sm:$0xff] %v709_v25  ;;  %v712_v26 = vpop.f32.mrb[8].mxu1 }
 0x2ac   : > { %v713_v27 = vadd.f32 %v712_v26, %v615_v8  ;;  %v714_v28 = vpop.f32.mrb[9].mxu1 }
 0x2ad   : > { %v715_v29 = vadd.f32 %v714_v28, %v619_v9 }
 0x2ae   : > { %743 = vst [vmem:[%s1584_s9 + $0x40] sm:$0xff] %v713_v27 }
 0x2af   : > { %744 = vst [vmem:[%s1584_s9 + $0x48] sm:$0xff] %v715_v29  ;;  %v718_v30 = vpop.f32.mrb[10].mxu1 }
 0x2b0   : > { %v719_v31 = vadd.f32 %v718_v30, %v615_v8  ;;  %v720_v32 = vpop.f32.mrb[11].mxu1 }
 0x2b1   : > { %v721_v33 = vadd.f32 %v720_v32, %v619_v9 }
 0x2b2   : > { %745 = vst [vmem:[%s1584_s9 + $0x50] sm:$0xff] %v719_v31 }
 0x2b3   : > { %746 = vst [vmem:[%s1584_s9 + $0x58] sm:$0xff] %v721_v33  ;;  %v724_v34 = vpop.f32.mrb[12].mxu1 }
 0x2b4   : > { %v725_v35 = vadd.f32 %v724_v34, %v615_v8  ;;  %v726_v36 = vpop.f32.mrb[13].mxu1 }
 0x2b5   : > { %v727_v37 = vadd.f32 %v726_v36, %v619_v9 }
 0x2b6   : > { %747 = vst [vmem:[%s1584_s9 + $0x60] sm:$0xff] %v725_v35 }
 0x2b7   : > { %748 = vst [vmem:[%s1584_s9 + $0x68] sm:$0xff] %v727_v37  ;;  %v730_v38 = vpop.f32.mrb[14].mxu1 }
 0x2b8   : > { %v731_v39 = vadd.f32 %v730_v38, %v615_v8  ;;  %v732_v40 = vpop.f32.mrb[15].mxu1 }
 0x2b9   : > { %v733_v41 = vadd.f32 %v732_v40, %v619_v9 }
 0x2ba   : > { %749 = vst [vmem:[%s1584_s9 + $0x70] sm:$0xff] %v731_v39 }
 0x2bb   : > { %750 = vst [vmem:[%s1584_s9 + $0x78] sm:$0xff] %v733_v41 }
 0x2bc   : > { %1222 = shalt.err (!%p1219_p11)
}
 0x2bd   : > { %s1223_s26 = scalar_lea.hbm %s1605_s7, 2048  ;;  %s1227_s6 = scalar_lea.hbm %s1663_s5, 4096 }
 0x2be   : > { %p1224_p0 = scmp.ne.s32.totalorder %s1605_s7, %s1223_s26  ;;  %p1228_p6 = scmp.lt.u32.totalorder %s1605_s7, %s1663_s5 }
 0x2bf   : > { %p1229_p7 = scmp.lt.u32.totalorder %s1227_s6, %s1223_s26  ;;  %p1231_p8 = scmp.lt.u32.totalorder %s1223_s26, %s1605_s7 }
 0x2c0   : > { %p1225_p4 = pnand %p1224_p0, %p1680_p12 }
 0x2c1   : > { %p1230_p2 = por %p1229_p7, %p1228_p6 }
 0x2c2   : > { %p1226_p13 = pneg %p1225_p4 }
 0x2c3   : > { %p1232_p1 = por %p1231_p8, %p1230_p2 }
 0x2c5   : > { %p1233_p10 = pnand %p1232_p1, %p1226_p13 }
 0x2c7   : > { %1236 = shalt.err (!%p1233_p10)
}
 0x2c8   : > { %s1303_s10 = smov 256   ;;  %s1304_s16 = smov 16  }
 0x2c9   : > { %1046 = dma.vmem_to_hbm [thread:$0]  (%p1680_p12), %s1607_s12, 2048, %s1605_s7, %s752_s21, %s1303_s10, %s1303_s10, %s1304_s16  }
 0x2ca PF: > { %s781_s14 = sand.u32 1, %s1275_s18   ;;  %p1681_p3 = scmp.ne.s32.totalorder %s1672_s29, 0 }
 0x2cb   : > { %p1682_p5 = scmp.ge.s32.totalorder %s1295_s23, 2  ;;  %s782_s27 = scalar_lea.sflag [#allocation4], %s781_s14 }
 0x2cd   : > { %p1060_p9 = pnand %p1682_p5, %p1681_p3 }
 0x2cf   : > { %1270 = dma.done.wait (!%p1060_p9), %s782_s27, 2048  }
 0x2d0   : > { %1272 = vsyncadd (!%p1060_p9), %s782_s27, 4294965248  ;;  %s22_s23 = sadd.s32 1, %s1295_s23   ;;  %s1683_s18 = smov %s1279_s19 }
 0x2d1   : > { %p19_p11 = scmp.ge.s32.totalorder %s22_s23, 4   ;;  %s1684_s19 = smov %s1283_s20 }
 0x2d2   : > { %s1685_s20 = smov %s1483_s17  ;;  %s1686_s21 = smov %s1291_s22 }
 0x2d3   : > { %s1687_s22 = smov %s1689_s8  ;;  %21 = sbr.rel (!%p19_p11) target bundleno = 7 (0x7), region = 98 }
 0x2da   :  { %787 = vsyncpa [#allocation3], 1 }
 0x2db   :  { %789 = vsyncpa [#allocation3 + $0x1], 1 }
 0x2dc   :  { %790 = vsyncpa [#allocation6], 1 }
 0x2dd   :  { %791 = vsyncpa [#allocation4], 1 }
 0x2de   :  { %793 = vsyncpa [#allocation4 + $0x1], 1 }

</bundles_post_ra>
